<compile_context>
chip_gen: v5e
topology: v5e:2x2
jax: 0.10.0
libtpu: 0.0.40
codegen_flags: <defaults>
</compile_context>

<pallas_src>
import numpy as np
import jax
import jax.numpy as jnp
from jax.experimental import pallas as pl
from jax.experimental.pallas import tpu as pltpu

# ---- module hyper-parameters (consistent with the PyTorch module) ----
NUM_MODELS = 2
BETA = 1.0
CAP = 10.0
BN_EPS = 1e-5
IN_H = 16
IN_W = 16
NUM_CLASSES = 15
LANE = 128

CHANNELS = ((1, 8), (8, 16), (16, 32))                   # (Cin, Cout) per conv
LAYER_HW = ((IN_H, IN_W),
            (IN_H // 2, IN_W // 2),
            (IN_H // 4, IN_W // 4))                      # conv output H, W
H3, W3 = LAYER_HW[2]
C3 = CHANNELS[2][1]
FEAT = H3 * W3 * C3                                      # 512 features / model


# ------------------------------ kernel helpers -------------------------------

def _swishc(y):
    # SwishC: where(x < cap, x * sigmoid(beta * x), cap)  (matches torch.where)
    return jnp.where(y < CAP, y * jax.nn.sigmoid(BETA * y), CAP)


def _conv3(xp, a_ref, h, n):
    # xp: [(h+2)*n, W*Cin] vertically padded h-major rows; a_ref: (3, W*Cin, W*Cout).
    # One batched MXU matmul per vertical tap; horizontal taps, channel mixing
    # and horizontal padding are folded into the block-diagonal A (built at init).
    acc = jnp.dot(xp[0:h * n, :], a_ref[0], preferred_element_type=jnp.float32)
    acc = acc + jnp.dot(xp[n:(h + 1) * n, :], a_ref[1],
                        preferred_element_type=jnp.float32)
    acc = acc + jnp.dot(xp[2 * n:(h + 2) * n, :], a_ref[2],
                        preferred_element_type=jnp.float32)
    return acc


def _pool_pad(y, sc_ref, sr_ref):
    # 2x2 stride-2 max pool + vertical zero-pad for the next conv, done with
    # 0/1 selection matmuls on the MXU (no lane/sublane shuffles on VPU/XLU):
    #   horizontal pair-max: max(y @ Sc_even, y @ Sc_odd)
    #   vertical  pair-max + pad: max(Sr_even @ hc, Sr_odd @ hc)
    hc = jnp.maximum(
        jnp.dot(y, sc_ref[0], preferred_element_type=jnp.float32),
        jnp.dot(y, sc_ref[1], preferred_element_type=jnp.float32))
    return jnp.maximum(
        jnp.dot(sr_ref[0], hc, preferred_element_type=jnp.float32),
        jnp.dot(sr_ref[1], hc, preferred_element_type=jnp.float32))


# ------------------------------ fused kernel ---------------------------------

def _fused_cnn_kernel(x_ref, a1_ref, a2_ref, a3_ref, b1_ref, b2_ref, b3_ref,
                      wl_ref, bl_ref, sc1_ref, sc2_ref, sr1_ref, sr2_ref,
                      o_ref):
    # One grid step per ensemble member ("parallel"); the whole CNN for that
    # member runs here, batched over samples along the sublane dimension.
    n = o_ref.shape[1]                         # batch size

    xp1 = x_ref[...]                           # [(16+2)*n, 16]
    y1 = _swishc(_conv3(xp1, a1_ref, LAYER_HW[0][0], n) + b1_ref[...])  # [16n,128]
    xp2 = _pool_pad(y1, sc1_ref, sr1_ref)                               # [(8+2)n,64]
    y2 = _swishc(_conv3(xp2, a2_ref, LAYER_HW[1][0], n) + b2_ref[...])  # [8n,128]
    xp3 = _pool_pad(y2, sc2_ref, sr2_ref)                               # [(4+2)n,64]
    y3 = _swishc(_conv3(xp3, a3_ref, LAYER_HW[2][0], n) + b3_ref[...])  # [4n,128]

    # classifier: 4 accumulated [n,128] x [128,128] matmuls (no flatten shuffle)
    acc = jnp.dot(y3[0:n, :], wl_ref[0], preferred_element_type=jnp.float32)
    for h in range(1, H3):
        acc = acc + jnp.dot(y3[h * n:(h + 1) * n, :], wl_ref[h],
                            preferred_element_type=jnp.float32)
    logits = acc + bl_ref[...]                                          # [n,128]
    o_ref[...] = logits[jnp.newaxis].astype(o_ref.dtype)                # [1,n,128]


# ------------------------------ init / packing -------------------------------

def init_and_pack_params(key):
    """Initialize per the PyTorch module (kaiming fan_out conv weights, zero
    conv bias, eval-mode BatchNorm with default running stats, torch Linear
    default init) and pre-pack everything into the layouts the fused kernel
    consumes.  All repacking is hoisted out of the forward pass."""
    bn_scale = 1.0 / float(np.sqrt(1.0 + BN_EPS))
    a_per_layer = [[] for _ in range(3)]
    b_per_layer = [[] for _ in range(3)]
    wl_list, bl_list = [], []

    model_keys = jax.random.split(key, NUM_MODELS)
    for mk in model_keys:
        k0, k1, k2, klw, klb = jax.random.split(mk, 5)
        conv_keys = (k0, k1, k2)
        for li, (cin, cout) in enumerate(CHANNELS):
            std = (2.0 / (cout * 9)) ** 0.5              # kaiming, fan_out, relu
            w = std * jax.random.normal(conv_keys[li], (cout, cin, 3, 3),
                                        jnp.float32)
            wf = np.asarray(w) * bn_scale                # fold eval-mode BN scale
            _, wd = LAYER_HW[li]
            # Block-diagonal packing over the UNPADDED width (horizontal pad
            # folded in by omitting rows that would read border columns):
            #   A[di][(j+dj-1)*Cin + c, j*Cout + o] = w[o, c, di, dj]
            a = np.zeros((3, wd * cin, wd * cout), np.float32)
            for di in range(3):
                for dj in range(3):
                    tap = wf[:, :, di, dj].T             # [cin, cout]
                    for j in range(wd):
                        jj = j + dj - 1
                        if 0 <= jj < wd:
                            a[di, jj * cin:(jj + 1) * cin,
                              j * cout:(j + 1) * cout] = tap
            a_per_layer[li].append(a)
            # conv bias = 0 and BN shift = 0 -> folded bias row is zero
            b_per_layer[li].append(np.zeros((1, wd * cout), np.float32))

        bound = 1.0 / FEAT ** 0.5                        # torch.nn.Linear default
        lw = jax.random.uniform(klw, (NUM_CLASSES, FEAT), jnp.float32,
                                -bound, bound)
        lb = jax.random.uniform(klb, (NUM_CLASSES,), jnp.float32, -bound, bound)
        lw_np = np.asarray(lw)
        # torch flattens NCHW -> feature index c*H3*W3 + h*W3 + w; the kernel's
        # y3 rows are h-major with lane index w*C3 + c.  Split the permuted
        # weight by h (4 chunks of [128, 128]) and pad classes 15 -> 128 lanes.
        wl = np.zeros((H3, W3 * C3, LANE), np.float32)
        for h in range(H3):
            for w_ in range(W3):
                for c in range(C3):
                    wl[h, w_ * C3 + c, :NUM_CLASSES] = \
                        lw_np[:, c * H3 * W3 + h * W3 + w_]
        bl = np.zeros((1, LANE), np.float32)
        bl[0, :NUM_CLASSES] = np.asarray(lb)
        wl_list.append(wl)
        bl_list.append(bl)

    return {
        'A1': jnp.asarray(np.stack(a_per_layer[0])),     # [M, 3, 16, 128]
        'A2': jnp.asarray(np.stack(a_per_layer[1])),     # [M, 3, 64, 128]
        'A3': jnp.asarray(np.stack(a_per_layer[2])),     # [M, 3, 64, 128]
        'B1': jnp.asarray(np.stack(b_per_layer[0])),     # [M, 1, 128]
        'B2': jnp.asarray(np.stack(b_per_layer[1])),
        'B3': jnp.asarray(np.stack(b_per_layer[2])),
        'WL': jnp.asarray(np.stack(wl_list)),            # [M, 4, 128, 128]
        'BL': jnp.asarray(np.stack(bl_list)),            # [M, 1, 128]
    }


def _pool_matrices(n):
    """0/1 selection matrices for the two maxpool layers (trace-time numpy).
    Column matrices [2, W*c, (W/2)*c] pick even/odd pooled columns; row
    matrices [2, (H/2+2)*n, H*n] pick even/odd pooled rows AND bake in the
    vertical zero-padding rows needed by the following conv."""
    out = []
    for li in range(2):
        h, w = LAYER_HW[li]
        c = CHANNELS[li][1]
        wc, wc2 = w * c, (w // 2) * c
        sc = np.zeros((2, wc, wc2), np.float32)
        for j in range(w // 2):
            for k in range(c):
                sc[0, (2 * j) * c + k, j * c + k] = 1.0
                sc[1, (2 * j + 1) * c + k, j * c + k] = 1.0
        hp = h // 2
        sr = np.zeros((2, (hp + 2) * n, h * n), np.float32)
        for i in range(hp):
            for b in range(n):
                sr[0, (i + 1) * n + b, (2 * i) * n + b] = 1.0
                sr[1, (i + 1) * n + b, (2 * i + 1) * n + b] = 1.0
        out.append((jnp.asarray(sc), jnp.asarray(sr)))
    return out


# ------------------------------ forward --------------------------------------

def _per_model_spec(arr):
    nd = arr.ndim
    return pl.BlockSpec((None,) + tuple(arr.shape[1:]),
                        lambda m, _nd=nd: (m,) + (0,) * (_nd - 1))


def _shared_spec(arr):
    nd = arr.ndim
    return pl.BlockSpec(tuple(arr.shape), lambda m, _nd=nd: (0,) * _nd)


def ensemble_forward(x_nchw, pk):
    n = x_nchw.shape[0]
    # NCHW (C=1) -> vertically padded h-major row layout [(H+2)*N, W].
    # (Horizontal padding is folded into the packed conv weights.)
    xpad = jnp.pad(x_nchw[:, 0, :, :], ((0, 0), (1, 1), (0, 0)))   # [N, 18, 16]
    x2d = jnp.transpose(xpad, (1, 0, 2)).reshape((IN_H + 2) * n, IN_W)

    (sc1, sr1), (sc2, sr2) = _pool_matrices(n)

    conv_flops = 2 * sum(h * w * co * 9 * ci
                         for (ci, co), (h, w) in zip(CHANNELS, LAYER_HW))
    pool_flops = 0
    for li in range(2):
        h, w = LAYER_HW[li]
        co = CHANNELS[li][1]
        pool_flops += 2 * 2 * h * (w * co) * ((w // 2) * co)
        pool_flops += 2 * 2 * (h // 2 + 2) * h * ((w // 2) * co)
    flops = int((conv_flops + pool_flops + 2 * FEAT * LANE) * NUM_MODELS * n)
    transcendentals = int(sum(h * w * co for (_, co), (h, w)
                              in zip(CHANNELS, LAYER_HW)) * NUM_MODELS * n)
    bytes_accessed = int(4 * (x2d.size
                              + sum(int(v.size) for v in pk.values())
                              + sc1.size + sc2.size + sr1.size + sr2.size
                              + NUM_MODELS * n * LANE))

    in_specs = [_shared_spec(x2d)]
    in_specs += [_per_model_spec(pk[k])
                 for k in ('A1', 'A2', 'A3', 'B1', 'B2', 'B3', 'WL', 'BL')]
    in_specs += [_shared_spec(s) for s in (sc1, sc2, sr1, sr2)]

    per_model = pl.pallas_call(
        _fused_cnn_kernel,
        grid=(NUM_MODELS,),
        in_specs=in_specs,
        out_specs=pl.BlockSpec((1, n, LANE), lambda m: (m, 0, 0)),
        out_shape=jax.ShapeDtypeStruct((NUM_MODELS, n, LANE), jnp.float32),
        compiler_params=pltpu.CompilerParams(
            dimension_semantics=("parallel",)),
        cost_estimate=pl.CostEstimate(flops=flops,
                                      transcendentals=transcendentals,
                                      bytes_accessed=bytes_accessed),
    )(x2d, pk['A1'], pk['A2'], pk['A3'], pk['B1'], pk['B2'], pk['B3'],
      pk['WL'], pk['BL'], sc1, sc2, sr1, sr2)

    # ensemble average + drop the lane padding of the class dimension
    return jnp.mean(per_model[:, :, :NUM_CLASSES], axis=0)


if __name__ == "__main__":
    root = jax.random.PRNGKey(0)
    xkey, pkey = jax.random.split(root)

    # small input consistent with the module: batch=2, 1 channel, 16x16
    x = jax.random.normal(xkey, (2, 1, IN_H, IN_W), jnp.float32)
    pk = init_and_pack_params(pkey)

    out = jax.jit(ensemble_forward)(x, pk)
    out = jax.block_until_ready(out)
    assert out.shape == (2, NUM_CLASSES) and out.dtype == jnp.float32
    assert bool(jnp.all(jnp.isfinite(out)))
    print("KERNEL_OK")
</pallas_src>

<mosaic_0001>
module attributes {stable_mosaic.version = 11 : i64} {
  func.func @_fused_cnn_kernel(%arg0: i32, %arg1: memref<36x16xf32, #tpu.memory_space<vmem>>, %arg2: memref<1x3x16x128xf32, #tpu.memory_space<vmem>>, %arg3: memref<1x3x64x128xf32, #tpu.memory_space<vmem>>, %arg4: memref<1x3x64x128xf32, #tpu.memory_space<vmem>>, %arg5: memref<1x1x128xf32, #tpu.memory_space<vmem>>, %arg6: memref<1x1x128xf32, #tpu.memory_space<vmem>>, %arg7: memref<1x1x128xf32, #tpu.memory_space<vmem>>, %arg8: memref<1x4x128x128xf32, #tpu.memory_space<vmem>>, %arg9: memref<1x1x128xf32, #tpu.memory_space<vmem>>, %arg10: memref<2x128x64xf32, #tpu.memory_space<vmem>>, %arg11: memref<2x128x64xf32, #tpu.memory_space<vmem>>, %arg12: memref<2x20x32xf32, #tpu.memory_space<vmem>>, %arg13: memref<2x12x16xf32, #tpu.memory_space<vmem>>, %arg14: memref<1x2x128xf32, #tpu.memory_space<vmem>>) attributes {dimension_semantics = [#tpu.dimension_semantics<parallel>], iteration_bounds = array<i64: 2>, scalar_prefetch = 0 : i64, scratch_operands = 0 : i64, tpu.core_type = #tpu.core_type<tc>, window_params = [{pipeline_mode = #tpu.pipeline_mode<synchronous>, transform_indices = @transform_0, window_bounds = array<i64: 36, 16>}, {transform_indices = @transform_1, window_bounds = array<i64: 1, 3, 16, 128>}, {transform_indices = @transform_2, window_bounds = array<i64: 1, 3, 64, 128>}, {transform_indices = @transform_3, window_bounds = array<i64: 1, 3, 64, 128>}, {transform_indices = @transform_4, window_bounds = array<i64: 1, 1, 128>}, {transform_indices = @transform_5, window_bounds = array<i64: 1, 1, 128>}, {transform_indices = @transform_6, window_bounds = array<i64: 1, 1, 128>}, {transform_indices = @transform_7, window_bounds = array<i64: 1, 4, 128, 128>}, {transform_indices = @transform_8, window_bounds = array<i64: 1, 1, 128>}, {pipeline_mode = #tpu.pipeline_mode<synchronous>, transform_indices = @transform_9, window_bounds = array<i64: 2, 128, 64>}, {pipeline_mode = #tpu.pipeline_mode<synchronous>, transform_indices = @transform_10, window_bounds = array<i64: 2, 128, 64>}, {pipeline_mode = #tpu.pipeline_mode<synchronous>, transform_indices = @transform_11, window_bounds = array<i64: 2, 20, 32>}, {pipeline_mode = #tpu.pipeline_mode<synchronous>, transform_indices = @transform_12, window_bounds = array<i64: 2, 12, 16>}, {transform_indices = @transform_13, window_bounds = array<i64: 1, 2, 128>}]} {
    %c0 = arith.constant 0 : index
    %c0_0 = arith.constant 0 : index
    %0 = vector.load %arg1[%c0, %c0_0] : memref<36x16xf32, #tpu.memory_space<vmem>>, vector<36x16xf32>
    %1 = vector.extract_strided_slice %0 {offsets = [0, 0], sizes = [32, 16], strides = [1, 1]} : vector<36x16xf32> to vector<32x16xf32>
    %c0_1 = arith.constant 0 : index
    %c0_2 = arith.constant 0 : index
    %c0_3 = arith.constant 0 : index
    %c0_4 = arith.constant 0 : index
    %2 = vector.load %arg2[%c0_1, %c0_2, %c0_3, %c0_4] : memref<1x3x16x128xf32, #tpu.memory_space<vmem>>, vector<1x1x16x128xf32>
    %3 = vector.shape_cast %2 : vector<1x1x16x128xf32> to vector<16x128xf32>
    %cst = arith.constant dense<0.000000e+00> : vector<32x128xf32>
    %4 = tpu.matmul %1, %3, %cst {dimension_numbers = #tpu.dot_dimension_numbers<[1], [0], [0], [1], [0, 0, 1, 1], [], []>} : vector<32x16xf32>, vector<16x128xf32>, vector<32x128xf32> -> vector<32x128xf32>
    %5 = vector.extract_strided_slice %0 {offsets = [2, 0], sizes = [32, 16], strides = [1, 1]} : vector<36x16xf32> to vector<32x16xf32>
    %c0_5 = arith.constant 0 : index
    %c1 = arith.constant 1 : index
    %c0_6 = arith.constant 0 : index
    %c0_7 = arith.constant 0 : index
    %6 = vector.load %arg2[%c0_5, %c1, %c0_6, %c0_7] : memref<1x3x16x128xf32, #tpu.memory_space<vmem>>, vector<1x1x16x128xf32>
    %7 = vector.shape_cast %6 : vector<1x1x16x128xf32> to vector<16x128xf32>
    %cst_8 = arith.constant dense<0.000000e+00> : vector<32x128xf32>
    %8 = tpu.matmul %5, %7, %cst_8 {dimension_numbers = #tpu.dot_dimension_numbers<[1], [0], [0], [1], [0, 0, 1, 1], [], []>} : vector<32x16xf32>, vector<16x128xf32>, vector<32x128xf32> -> vector<32x128xf32>
    %9 = arith.addf %4, %8 : vector<32x128xf32>
    %10 = vector.extract_strided_slice %0 {offsets = [4, 0], sizes = [32, 16], strides = [1, 1]} : vector<36x16xf32> to vector<32x16xf32>
    %c0_9 = arith.constant 0 : index
    %c2 = arith.constant 2 : index
    %c0_10 = arith.constant 0 : index
    %c0_11 = arith.constant 0 : index
    %11 = vector.load %arg2[%c0_9, %c2, %c0_10, %c0_11] : memref<1x3x16x128xf32, #tpu.memory_space<vmem>>, vector<1x1x16x128xf32>
    %12 = vector.shape_cast %11 : vector<1x1x16x128xf32> to vector<16x128xf32>
    %cst_12 = arith.constant dense<0.000000e+00> : vector<32x128xf32>
    %13 = tpu.matmul %10, %12, %cst_12 {dimension_numbers = #tpu.dot_dimension_numbers<[1], [0], [0], [1], [0, 0, 1, 1], [], []>} : vector<32x16xf32>, vector<16x128xf32>, vector<32x128xf32> -> vector<32x128xf32>
    %14 = arith.addf %9, %13 : vector<32x128xf32>
    %c0_13 = arith.constant 0 : index
    %c0_14 = arith.constant 0 : index
    %c0_15 = arith.constant 0 : index
    %15 = vector.load %arg5[%c0_13, %c0_14, %c0_15] : memref<1x1x128xf32, #tpu.memory_space<vmem>>, vector<1x1x128xf32>
    %16 = vector.shape_cast %15 : vector<1x1x128xf32> to vector<1x128xf32>
    %17 = vector.broadcast %16 : vector<1x128xf32> to vector<32x128xf32>
    %18 = arith.addf %14, %17 : vector<32x128xf32>
    %cst_16 = arith.constant 1.000000e+01 : f32
    %19 = vector.broadcast %cst_16 : f32 to vector<32x128xf32>
    %20 = arith.cmpf olt, %18, %19 : vector<32x128xf32>
    %cst_17 = arith.constant 1.000000e+00 : f32
    %21 = vector.broadcast %cst_17 : f32 to vector<32x128xf32>
    %22 = arith.mulf %21, %18 : vector<32x128xf32>
    %23 = arith.negf %22 : vector<32x128xf32>
    %24 = math.exp %23 : vector<32x128xf32>
    %cst_18 = arith.constant 1.000000e+00 : f32
    %25 = vector.broadcast %cst_18 : f32 to vector<32x128xf32>
    %26 = arith.addf %25, %24 : vector<32x128xf32>
    %27 = arith.divf %25, %26 : vector<32x128xf32>
    %28 = arith.mulf %18, %27 : vector<32x128xf32>
    %cst_19 = arith.constant 1.000000e+01 : f32
    %29 = vector.broadcast %cst_19 : f32 to vector<32x128xf32>
    %30 = arith.select %20, %28, %29 : vector<32x128xi1>, vector<32x128xf32>
    %c0_20 = arith.constant 0 : index
    %c0_21 = arith.constant 0 : index
    %c0_22 = arith.constant 0 : index
    %31 = vector.load %arg10[%c0_20, %c0_21, %c0_22] : memref<2x128x64xf32, #tpu.memory_space<vmem>>, vector<1x128x64xf32>
    %32 = vector.shape_cast %31 : vector<1x128x64xf32> to vector<128x64xf32>
    %cst_23 = arith.constant dense<0.000000e+00> : vector<32x64xf32>
    %33 = tpu.matmul %30, %32, %cst_23 {dimension_numbers = #tpu.dot_dimension_numbers<[1], [0], [0], [1], [0, 0, 1, 1], [], []>} : vector<32x128xf32>, vector<128x64xf32>, vector<32x64xf32> -> vector<32x64xf32>
    %c1_24 = arith.constant 1 : index
    %c0_25 = arith.constant 0 : index
    %c0_26 = arith.constant 0 : index
    %34 = vector.load %arg10[%c1_24, %c0_25, %c0_26] : memref<2x128x64xf32, #tpu.memory_space<vmem>>, vector<1x128x64xf32>
    %35 = vector.shape_cast %34 : vector<1x128x64xf32> to vector<128x64xf32>
    %cst_27 = arith.constant dense<0.000000e+00> : vector<32x64xf32>
    %36 = tpu.matmul %30, %35, %cst_27 {dimension_numbers = #tpu.dot_dimension_numbers<[1], [0], [0], [1], [0, 0, 1, 1], [], []>} : vector<32x128xf32>, vector<128x64xf32>, vector<32x64xf32> -> vector<32x64xf32>
    %37 = arith.maximumf %33, %36 : vector<32x64xf32>
    %c0_28 = arith.constant 0 : index
    %c0_29 = arith.constant 0 : index
    %c0_30 = arith.constant 0 : index
    %38 = vector.load %arg12[%c0_28, %c0_29, %c0_30] : memref<2x20x32xf32, #tpu.memory_space<vmem>>, vector<1x20x32xf32>
    %39 = vector.shape_cast %38 : vector<1x20x32xf32> to vector<20x32xf32>
    %cst_31 = arith.constant dense<0.000000e+00> : vector<20x64xf32>
    %40 = tpu.matmul %39, %37, %cst_31 {dimension_numbers = #tpu.dot_dimension_numbers<[1], [0], [0], [1], [0, 0, 1, 1], [], []>} : vector<20x32xf32>, vector<32x64xf32>, vector<20x64xf32> -> vector<20x64xf32>
    %c1_32 = arith.constant 1 : index
    %c0_33 = arith.constant 0 : index
    %c0_34 = arith.constant 0 : index
    %41 = vector.load %arg12[%c1_32, %c0_33, %c0_34] : memref<2x20x32xf32, #tpu.memory_space<vmem>>, vector<1x20x32xf32>
    %42 = vector.shape_cast %41 : vector<1x20x32xf32> to vector<20x32xf32>
    %cst_35 = arith.constant dense<0.000000e+00> : vector<20x64xf32>
    %43 = tpu.matmul %42, %37, %cst_35 {dimension_numbers = #tpu.dot_dimension_numbers<[1], [0], [0], [1], [0, 0, 1, 1], [], []>} : vector<20x32xf32>, vector<32x64xf32>, vector<20x64xf32> -> vector<20x64xf32>
    %44 = arith.maximumf %40, %43 : vector<20x64xf32>
    %45 = vector.extract_strided_slice %44 {offsets = [0, 0], sizes = [16, 64], strides = [1, 1]} : vector<20x64xf32> to vector<16x64xf32>
    %c0_36 = arith.constant 0 : index
    %c0_37 = arith.constant 0 : index
    %c0_38 = arith.constant 0 : index
    %c0_39 = arith.constant 0 : index
    %46 = vector.load %arg3[%c0_36, %c0_37, %c0_38, %c0_39] : memref<1x3x64x128xf32, #tpu.memory_space<vmem>>, vector<1x1x64x128xf32>
    %47 = vector.shape_cast %46 : vector<1x1x64x128xf32> to vector<64x128xf32>
    %cst_40 = arith.constant dense<0.000000e+00> : vector<16x128xf32>
    %48 = tpu.matmul %45, %47, %cst_40 {dimension_numbers = #tpu.dot_dimension_numbers<[1], [0], [0], [1], [0, 0, 1, 1], [], []>} : vector<16x64xf32>, vector<64x128xf32>, vector<16x128xf32> -> vector<16x128xf32>
    %49 = vector.extract_strided_slice %44 {offsets = [2, 0], sizes = [16, 64], strides = [1, 1]} : vector<20x64xf32> to vector<16x64xf32>
    %c0_41 = arith.constant 0 : index
    %c1_42 = arith.constant 1 : index
    %c0_43 = arith.constant 0 : index
    %c0_44 = arith.constant 0 : index
    %50 = vector.load %arg3[%c0_41, %c1_42, %c0_43, %c0_44] : memref<1x3x64x128xf32, #tpu.memory_space<vmem>>, vector<1x1x64x128xf32>
    %51 = vector.shape_cast %50 : vector<1x1x64x128xf32> to vector<64x128xf32>
    %cst_45 = arith.constant dense<0.000000e+00> : vector<16x128xf32>
    %52 = tpu.matmul %49, %51, %cst_45 {dimension_numbers = #tpu.dot_dimension_numbers<[1], [0], [0], [1], [0, 0, 1, 1], [], []>} : vector<16x64xf32>, vector<64x128xf32>, vector<16x128xf32> -> vector<16x128xf32>
    %53 = arith.addf %48, %52 : vector<16x128xf32>
    %54 = vector.extract_strided_slice %44 {offsets = [4, 0], sizes = [16, 64], strides = [1, 1]} : vector<20x64xf32> to vector<16x64xf32>
    %c0_46 = arith.constant 0 : index
    %c2_47 = arith.constant 2 : index
    %c0_48 = arith.constant 0 : index
    %c0_49 = arith.constant 0 : index
    %55 = vector.load %arg3[%c0_46, %c2_47, %c0_48, %c0_49] : memref<1x3x64x128xf32, #tpu.memory_space<vmem>>, vector<1x1x64x128xf32>
    %56 = vector.shape_cast %55 : vector<1x1x64x128xf32> to vector<64x128xf32>
    %cst_50 = arith.constant dense<0.000000e+00> : vector<16x128xf32>
    %57 = tpu.matmul %54, %56, %cst_50 {dimension_numbers = #tpu.dot_dimension_numbers<[1], [0], [0], [1], [0, 0, 1, 1], [], []>} : vector<16x64xf32>, vector<64x128xf32>, vector<16x128xf32> -> vector<16x128xf32>
    %58 = arith.addf %53, %57 : vector<16x128xf32>
    %c0_51 = arith.constant 0 : index
    %c0_52 = arith.constant 0 : index
    %c0_53 = arith.constant 0 : index
    %59 = vector.load %arg6[%c0_51, %c0_52, %c0_53] : memref<1x1x128xf32, #tpu.memory_space<vmem>>, vector<1x1x128xf32>
    %60 = vector.shape_cast %59 : vector<1x1x128xf32> to vector<1x128xf32>
    %61 = vector.broadcast %60 : vector<1x128xf32> to vector<16x128xf32>
    %62 = arith.addf %58, %61 : vector<16x128xf32>
    %cst_54 = arith.constant 1.000000e+01 : f32
    %63 = vector.broadcast %cst_54 : f32 to vector<16x128xf32>
    %64 = arith.cmpf olt, %62, %63 : vector<16x128xf32>
    %cst_55 = arith.constant 1.000000e+00 : f32
    %65 = vector.broadcast %cst_55 : f32 to vector<16x128xf32>
    %66 = arith.mulf %65, %62 : vector<16x128xf32>
    %67 = arith.negf %66 : vector<16x128xf32>
    %68 = math.exp %67 : vector<16x128xf32>
    %cst_56 = arith.constant 1.000000e+00 : f32
    %69 = vector.broadcast %cst_56 : f32 to vector<16x128xf32>
    %70 = arith.addf %69, %68 : vector<16x128xf32>
    %71 = arith.divf %69, %70 : vector<16x128xf32>
    %72 = arith.mulf %62, %71 : vector<16x128xf32>
    %cst_57 = arith.constant 1.000000e+01 : f32
    %73 = vector.broadcast %cst_57 : f32 to vector<16x128xf32>
    %74 = arith.select %64, %72, %73 : vector<16x128xi1>, vector<16x128xf32>
    %c0_58 = arith.constant 0 : index
    %c0_59 = arith.constant 0 : index
    %c0_60 = arith.constant 0 : index
    %75 = vector.load %arg11[%c0_58, %c0_59, %c0_60] : memref<2x128x64xf32, #tpu.memory_space<vmem>>, vector<1x128x64xf32>
    %76 = vector.shape_cast %75 : vector<1x128x64xf32> to vector<128x64xf32>
    %cst_61 = arith.constant dense<0.000000e+00> : vector<16x64xf32>
    %77 = tpu.matmul %74, %76, %cst_61 {dimension_numbers = #tpu.dot_dimension_numbers<[1], [0], [0], [1], [0, 0, 1, 1], [], []>} : vector<16x128xf32>, vector<128x64xf32>, vector<16x64xf32> -> vector<16x64xf32>
    %c1_62 = arith.constant 1 : index
    %c0_63 = arith.constant 0 : index
    %c0_64 = arith.constant 0 : index
    %78 = vector.load %arg11[%c1_62, %c0_63, %c0_64] : memref<2x128x64xf32, #tpu.memory_space<vmem>>, vector<1x128x64xf32>
    %79 = vector.shape_cast %78 : vector<1x128x64xf32> to vector<128x64xf32>
    %cst_65 = arith.constant dense<0.000000e+00> : vector<16x64xf32>
    %80 = tpu.matmul %74, %79, %cst_65 {dimension_numbers = #tpu.dot_dimension_numbers<[1], [0], [0], [1], [0, 0, 1, 1], [], []>} : vector<16x128xf32>, vector<128x64xf32>, vector<16x64xf32> -> vector<16x64xf32>
    %81 = arith.maximumf %77, %80 : vector<16x64xf32>
    %c0_66 = arith.constant 0 : index
    %c0_67 = arith.constant 0 : index
    %c0_68 = arith.constant 0 : index
    %82 = vector.load %arg13[%c0_66, %c0_67, %c0_68] : memref<2x12x16xf32, #tpu.memory_space<vmem>>, vector<1x12x16xf32>
    %83 = vector.shape_cast %82 : vector<1x12x16xf32> to vector<12x16xf32>
    %cst_69 = arith.constant dense<0.000000e+00> : vector<12x64xf32>
    %84 = tpu.matmul %83, %81, %cst_69 {dimension_numbers = #tpu.dot_dimension_numbers<[1], [0], [0], [1], [0, 0, 1, 1], [], []>} : vector<12x16xf32>, vector<16x64xf32>, vector<12x64xf32> -> vector<12x64xf32>
    %c1_70 = arith.constant 1 : index
    %c0_71 = arith.constant 0 : index
    %c0_72 = arith.constant 0 : index
    %85 = vector.load %arg13[%c1_70, %c0_71, %c0_72] : memref<2x12x16xf32, #tpu.memory_space<vmem>>, vector<1x12x16xf32>
    %86 = vector.shape_cast %85 : vector<1x12x16xf32> to vector<12x16xf32>
    %cst_73 = arith.constant dense<0.000000e+00> : vector<12x64xf32>
    %87 = tpu.matmul %86, %81, %cst_73 {dimension_numbers = #tpu.dot_dimension_numbers<[1], [0], [0], [1], [0, 0, 1, 1], [], []>} : vector<12x16xf32>, vector<16x64xf32>, vector<12x64xf32> -> vector<12x64xf32>
    %88 = arith.maximumf %84, %87 : vector<12x64xf32>
    %89 = vector.extract_strided_slice %88 {offsets = [0, 0], sizes = [8, 64], strides = [1, 1]} : vector<12x64xf32> to vector<8x64xf32>
    %c0_74 = arith.constant 0 : index
    %c0_75 = arith.constant 0 : index
    %c0_76 = arith.constant 0 : index
    %c0_77 = arith.constant 0 : index
    %90 = vector.load %arg4[%c0_74, %c0_75, %c0_76, %c0_77] : memref<1x3x64x128xf32, #tpu.memory_space<vmem>>, vector<1x1x64x128xf32>
    %91 = vector.shape_cast %90 : vector<1x1x64x128xf32> to vector<64x128xf32>
    %cst_78 = arith.constant dense<0.000000e+00> : vector<8x128xf32>
    %92 = tpu.matmul %89, %91, %cst_78 {dimension_numbers = #tpu.dot_dimension_numbers<[1], [0], [0], [1], [0, 0, 1, 1], [], []>} : vector<8x64xf32>, vector<64x128xf32>, vector<8x128xf32> -> vector<8x128xf32>
    %93 = vector.extract_strided_slice %88 {offsets = [2, 0], sizes = [8, 64], strides = [1, 1]} : vector<12x64xf32> to vector<8x64xf32>
    %c0_79 = arith.constant 0 : index
    %c1_80 = arith.constant 1 : index
    %c0_81 = arith.constant 0 : index
    %c0_82 = arith.constant 0 : index
    %94 = vector.load %arg4[%c0_79, %c1_80, %c0_81, %c0_82] : memref<1x3x64x128xf32, #tpu.memory_space<vmem>>, vector<1x1x64x128xf32>
    %95 = vector.shape_cast %94 : vector<1x1x64x128xf32> to vector<64x128xf32>
    %cst_83 = arith.constant dense<0.000000e+00> : vector<8x128xf32>
    %96 = tpu.matmul %93, %95, %cst_83 {dimension_numbers = #tpu.dot_dimension_numbers<[1], [0], [0], [1], [0, 0, 1, 1], [], []>} : vector<8x64xf32>, vector<64x128xf32>, vector<8x128xf32> -> vector<8x128xf32>
    %97 = arith.addf %92, %96 : vector<8x128xf32>
    %98 = vector.extract_strided_slice %88 {offsets = [4, 0], sizes = [8, 64], strides = [1, 1]} : vector<12x64xf32> to vector<8x64xf32>
    %c0_84 = arith.constant 0 : index
    %c2_85 = arith.constant 2 : index
    %c0_86 = arith.constant 0 : index
    %c0_87 = arith.constant 0 : index
    %99 = vector.load %arg4[%c0_84, %c2_85, %c0_86, %c0_87] : memref<1x3x64x128xf32, #tpu.memory_space<vmem>>, vector<1x1x64x128xf32>
    %100 = vector.shape_cast %99 : vector<1x1x64x128xf32> to vector<64x128xf32>
    %cst_88 = arith.constant dense<0.000000e+00> : vector<8x128xf32>
    %101 = tpu.matmul %98, %100, %cst_88 {dimension_numbers = #tpu.dot_dimension_numbers<[1], [0], [0], [1], [0, 0, 1, 1], [], []>} : vector<8x64xf32>, vector<64x128xf32>, vector<8x128xf32> -> vector<8x128xf32>
    %102 = arith.addf %97, %101 : vector<8x128xf32>
    %c0_89 = arith.constant 0 : index
    %c0_90 = arith.constant 0 : index
    %c0_91 = arith.constant 0 : index
    %103 = vector.load %arg7[%c0_89, %c0_90, %c0_91] : memref<1x1x128xf32, #tpu.memory_space<vmem>>, vector<1x1x128xf32>
    %104 = vector.shape_cast %103 : vector<1x1x128xf32> to vector<1x128xf32>
    %105 = vector.broadcast %104 : vector<1x128xf32> to vector<8x128xf32>
    %106 = arith.addf %102, %105 : vector<8x128xf32>
    %cst_92 = arith.constant 1.000000e+01 : f32
    %107 = vector.broadcast %cst_92 : f32 to vector<8x128xf32>
    %108 = arith.cmpf olt, %106, %107 : vector<8x128xf32>
    %cst_93 = arith.constant 1.000000e+00 : f32
    %109 = vector.broadcast %cst_93 : f32 to vector<8x128xf32>
    %110 = arith.mulf %109, %106 : vector<8x128xf32>
    %111 = arith.negf %110 : vector<8x128xf32>
    %112 = math.exp %111 : vector<8x128xf32>
    %cst_94 = arith.constant 1.000000e+00 : f32
    %113 = vector.broadcast %cst_94 : f32 to vector<8x128xf32>
    %114 = arith.addf %113, %112 : vector<8x128xf32>
    %115 = arith.divf %113, %114 : vector<8x128xf32>
    %116 = arith.mulf %106, %115 : vector<8x128xf32>
    %cst_95 = arith.constant 1.000000e+01 : f32
    %117 = vector.broadcast %cst_95 : f32 to vector<8x128xf32>
    %118 = arith.select %108, %116, %117 : vector<8x128xi1>, vector<8x128xf32>
    %119 = vector.extract_strided_slice %118 {offsets = [0, 0], sizes = [2, 128], strides = [1, 1]} : vector<8x128xf32> to vector<2x128xf32>
    %c0_96 = arith.constant 0 : index
    %c0_97 = arith.constant 0 : index
    %c0_98 = arith.constant 0 : index
    %c0_99 = arith.constant 0 : index
    %120 = vector.load %arg8[%c0_96, %c0_97, %c0_98, %c0_99] : memref<1x4x128x128xf32, #tpu.memory_space<vmem>>, vector<1x1x128x128xf32>
    %121 = vector.shape_cast %120 : vector<1x1x128x128xf32> to vector<128x128xf32>
    %cst_100 = arith.constant dense<0.000000e+00> : vector<2x128xf32>
    %122 = tpu.matmul %119, %121, %cst_100 {dimension_numbers = #tpu.dot_dimension_numbers<[1], [0], [0], [1], [0, 0, 1, 1], [], []>} : vector<2x128xf32>, vector<128x128xf32>, vector<2x128xf32> -> vector<2x128xf32>
    %123 = vector.extract_strided_slice %118 {offsets = [2, 0], sizes = [2, 128], strides = [1, 1]} : vector<8x128xf32> to vector<2x128xf32>
    %c0_101 = arith.constant 0 : index
    %c1_102 = arith.constant 1 : index
    %c0_103 = arith.constant 0 : index
    %c0_104 = arith.constant 0 : index
    %124 = vector.load %arg8[%c0_101, %c1_102, %c0_103, %c0_104] : memref<1x4x128x128xf32, #tpu.memory_space<vmem>>, vector<1x1x128x128xf32>
    %125 = vector.shape_cast %124 : vector<1x1x128x128xf32> to vector<128x128xf32>
    %cst_105 = arith.constant dense<0.000000e+00> : vector<2x128xf32>
    %126 = tpu.matmul %123, %125, %cst_105 {dimension_numbers = #tpu.dot_dimension_numbers<[1], [0], [0], [1], [0, 0, 1, 1], [], []>} : vector<2x128xf32>, vector<128x128xf32>, vector<2x128xf32> -> vector<2x128xf32>
    %127 = arith.addf %122, %126 : vector<2x128xf32>
    %128 = vector.extract_strided_slice %118 {offsets = [4, 0], sizes = [2, 128], strides = [1, 1]} : vector<8x128xf32> to vector<2x128xf32>
    %c0_106 = arith.constant 0 : index
    %c2_107 = arith.constant 2 : index
    %c0_108 = arith.constant 0 : index
    %c0_109 = arith.constant 0 : index
    %129 = vector.load %arg8[%c0_106, %c2_107, %c0_108, %c0_109] : memref<1x4x128x128xf32, #tpu.memory_space<vmem>>, vector<1x1x128x128xf32>
    %130 = vector.shape_cast %129 : vector<1x1x128x128xf32> to vector<128x128xf32>
    %cst_110 = arith.constant dense<0.000000e+00> : vector<2x128xf32>
    %131 = tpu.matmul %128, %130, %cst_110 {dimension_numbers = #tpu.dot_dimension_numbers<[1], [0], [0], [1], [0, 0, 1, 1], [], []>} : vector<2x128xf32>, vector<128x128xf32>, vector<2x128xf32> -> vector<2x128xf32>
    %132 = arith.addf %127, %131 : vector<2x128xf32>
    %133 = vector.extract_strided_slice %118 {offsets = [6, 0], sizes = [2, 128], strides = [1, 1]} : vector<8x128xf32> to vector<2x128xf32>
    %c0_111 = arith.constant 0 : index
    %c3 = arith.constant 3 : index
    %c0_112 = arith.constant 0 : index
    %c0_113 = arith.constant 0 : index
    %134 = vector.load %arg8[%c0_111, %c3, %c0_112, %c0_113] : memref<1x4x128x128xf32, #tpu.memory_space<vmem>>, vector<1x1x128x128xf32>
    %135 = vector.shape_cast %134 : vector<1x1x128x128xf32> to vector<128x128xf32>
    %cst_114 = arith.constant dense<0.000000e+00> : vector<2x128xf32>
    %136 = tpu.matmul %133, %135, %cst_114 {dimension_numbers = #tpu.dot_dimension_numbers<[1], [0], [0], [1], [0, 0, 1, 1], [], []>} : vector<2x128xf32>, vector<128x128xf32>, vector<2x128xf32> -> vector<2x128xf32>
    %137 = arith.addf %132, %136 : vector<2x128xf32>
    %c0_115 = arith.constant 0 : index
    %c0_116 = arith.constant 0 : index
    %c0_117 = arith.constant 0 : index
    %138 = vector.load %arg9[%c0_115, %c0_116, %c0_117] : memref<1x1x128xf32, #tpu.memory_space<vmem>>, vector<1x1x128xf32>
    %139 = vector.shape_cast %138 : vector<1x1x128xf32> to vector<1x128xf32>
    %140 = vector.broadcast %139 : vector<1x128xf32> to vector<2x128xf32>
    %141 = arith.addf %137, %140 : vector<2x128xf32>
    %142 = vector.shape_cast %141 : vector<2x128xf32> to vector<1x2x128xf32>
    %c0_118 = arith.constant 0 : index
    %c0_119 = arith.constant 0 : index
    %c0_120 = arith.constant 0 : index
    %143 = vector.load %arg14[%c0_118, %c0_119, %c0_120] : memref<1x2x128xf32, #tpu.memory_space<vmem>>, vector<1x2x128xf32>
    tpu.vector_store %arg14[%c0_118, %c0_119, %c0_120], %142 {strides = array<i32>} : memref<1x2x128xf32, #tpu.memory_space<vmem>>, vector<1x2x128xf32>,
    return
  }
  func.func @transform_0(%arg0: i32) -> (i32, i32) {
    %c0_i32 = arith.constant 0 : i32
    %c0_i32_0 = arith.constant 0 : i32
    %c0_i32_1 = arith.constant 0 : i32
    return %c0_i32, %c0_i32_0 : i32, i32
  }
  func.func @transform_1(%arg0: i32) -> (i32, i32, i32, i32) {
    %c0_i32 = arith.constant 0 : i32
    %c0_i32_0 = arith.constant 0 : i32
    %c0_i32_1 = arith.constant 0 : i32
    %c0_i32_2 = arith.constant 0 : i32
    return %arg0, %c0_i32, %c0_i32_0, %c0_i32_1 : i32, i32, i32, i32
  }
  func.func @transform_2(%arg0: i32) -> (i32, i32, i32, i32) {
    %c0_i32 = arith.constant 0 : i32
    %c0_i32_0 = arith.constant 0 : i32
    %c0_i32_1 = arith.constant 0 : i32
    %c0_i32_2 = arith.constant 0 : i32
    return %arg0, %c0_i32, %c0_i32_0, %c0_i32_1 : i32, i32, i32, i32
  }
  func.func @transform_3(%arg0: i32) -> (i32, i32, i32, i32) {
    %c0_i32 = arith.constant 0 : i32
    %c0_i32_0 = arith.constant 0 : i32
    %c0_i32_1 = arith.constant 0 : i32
    %c0_i32_2 = arith.constant 0 : i32
    return %arg0, %c0_i32, %c0_i32_0, %c0_i32_1 : i32, i32, i32, i32
  }
  func.func @transform_4(%arg0: i32) -> (i32, i32, i32) {
    %c0_i32 = arith.constant 0 : i32
    %c0_i32_0 = arith.constant 0 : i32
    %c0_i32_1 = arith.constant 0 : i32
    return %arg0, %c0_i32, %c0_i32_0 : i32, i32, i32
  }
  func.func @transform_5(%arg0: i32) -> (i32, i32, i32) {
    %c0_i32 = arith.constant 0 : i32
    %c0_i32_0 = arith.constant 0 : i32
    %c0_i32_1 = arith.constant 0 : i32
    return %arg0, %c0_i32, %c0_i32_0 : i32, i32, i32
  }
  func.func @transform_6(%arg0: i32) -> (i32, i32, i32) {
    %c0_i32 = arith.constant 0 : i32
    %c0_i32_0 = arith.constant 0 : i32
    %c0_i32_1 = arith.constant 0 : i32
    return %arg0, %c0_i32, %c0_i32_0 : i32, i32, i32
  }
  func.func @transform_7(%arg0: i32) -> (i32, i32, i32, i32) {
    %c0_i32 = arith.constant 0 : i32
    %c0_i32_0 = arith.constant 0 : i32
    %c0_i32_1 = arith.constant 0 : i32
    %c0_i32_2 = arith.constant 0 : i32
    return %arg0, %c0_i32, %c0_i32_0, %c0_i32_1 : i32, i32, i32, i32
  }
  func.func @transform_8(%arg0: i32) -> (i32, i32, i32) {
    %c0_i32 = arith.constant 0 : i32
    %c0_i32_0 = arith.constant 0 : i32
    %c0_i32_1 = arith.constant 0 : i32
    return %arg0, %c0_i32, %c0_i32_0 : i32, i32, i32
  }
  func.func @transform_9(%arg0: i32) -> (i32, i32, i32) {
    %c0_i32 = arith.constant 0 : i32
    %c0_i32_0 = arith.constant 0 : i32
    %c0_i32_1 = arith.constant 0 : i32
    %c0_i32_2 = arith.constant 0 : i32
    return %c0_i32, %c0_i32_0, %c0_i32_1 : i32, i32, i32
  }
  func.func @transform_10(%arg0: i32) -> (i32, i32, i32) {
    %c0_i32 = arith.constant 0 : i32
    %c0_i32_0 = arith.constant 0 : i32
    %c0_i32_1 = arith.constant 0 : i32
    %c0_i32_2 = arith.constant 0 : i32
    return %c0_i32, %c0_i32_0, %c0_i32_1 : i32, i32, i32
  }
  func.func @transform_11(%arg0: i32) -> (i32, i32, i32) {
    %c0_i32 = arith.constant 0 : i32
    %c0_i32_0 = arith.constant 0 : i32
    %c0_i32_1 = arith.constant 0 : i32
    %c0_i32_2 = arith.constant 0 : i32
    return %c0_i32, %c0_i32_0, %c0_i32_1 : i32, i32, i32
  }
  func.func @transform_12(%arg0: i32) -> (i32, i32, i32) {
    %c0_i32 = arith.constant 0 : i32
    %c0_i32_0 = arith.constant 0 : i32
    %c0_i32_1 = arith.constant 0 : i32
    %c0_i32_2 = arith.constant 0 : i32
    return %c0_i32, %c0_i32_0, %c0_i32_1 : i32, i32, i32
  }
  func.func @transform_13(%arg0: i32) -> (i32, i32, i32) {
    %c0_i32 = arith.constant 0 : i32
    %c0_i32_0 = arith.constant 0 : i32
    %c0_i32_1 = arith.constant 0 : i32
    return %arg0, %c0_i32, %c0_i32_0 : i32, i32, i32
  }
}

</mosaic_0001>

<bundles_post_ra>
// kernel: ensemble_forward.1
= control target key start
LH: loop header
LB: loop body
LE: loop exit
PB: predicated region body
PF: predicated region fallthrough
CT: control target
= control target key end

     0   :  { %s2830_s0 = inlined_call_operand.vmem [shape: f32[36,16], index: 0, kind: input, shape index: {}]   ;;  %s2831_s1 = inlined_call_operand.vmem [shape: f32[2,3,16,128], index: 1, kind: input, shape index: {}]   ;;  %s2832_s2 = inlined_call_operand.hbm [shape: f32[2,3,64,128], index: 2, kind: input, shape index: {}]   ;;  %s2833_s3 = inlined_call_operand.hbm [shape: f32[2,3,64,128], index: 3, kind: input, shape index: {}]   ;;  %s2834_s4 = inlined_call_operand.vmem [shape: f32[2,1,128], index: 4, kind: input, shape index: {}]   ;;  %s2835_s5 = inlined_call_operand.vmem [shape: f32[2,1,128], index: 5, kind: input, shape index: {}]   ;;  %s2836_s6 = inlined_call_operand.vmem [shape: f32[2,1,128], index: 6, kind: input, shape index: {}]   ;;  %s2837_s7 = inlined_call_operand.hbm [shape: f32[2,4,128,128], index: 7, kind: input, shape index: {}]   ;;  %s2838_s8 = inlined_call_operand.vmem [shape: f32[2,1,128], index: 8, kind: input, shape index: {}]   ;;  %s2839_s9 = inlined_call_operand.hbm [shape: f32[2,128,64], index: 9, kind: input, shape index: {}]   ;;  %s2840_s10 = inlined_call_operand.hbm [shape: f32[2,128,64], index: 10, kind: input, shape index: {}]   ;;  %s2841_s11 = inlined_call_operand.vmem [shape: f32[2,20,32], index: 11, kind: input, shape index: {}]   ;;  %s2842_s12 = inlined_call_operand.vmem [shape: f32[2,12,16], index: 12, kind: input, shape index: {}]   ;;  %s2843_s13 = inlined_call_operand.vmem [shape: f32[2,2,128], index: 13, kind: output, shape index: {}]  }
   0x1   :  { %2855 = sst [smem:[#allocation16_spill]] %s2833_s3 }
   0x2   :  { %2856 = sst [smem:[#allocation17_spill]] %s2836_s6 }
   0x3   :  { %2857 = sst [smem:[#allocation18_spill]] %s2838_s8 }
   0x4   :  { %2858 = sst [smem:[#allocation19_spill]] %s2839_s9 }
   0x5   :  { %2859 = sst [smem:[#allocation20_spill]] %s2840_s10 }
   0x6   :  { %2860 = sst [smem:[#allocation21_spill]] %s2842_s12 }
   0x7   :  { %2861 = sst [smem:[#allocation22_spill]] %s2843_s13 }
   0x8   :  { %18 = vsyncpa [#allocation3], 0 }
   0x9   :  { %20 = vsyncpa [#allocation3 + $0x1], 0 }
   0xa   :  { %21 = vsyncpa [#allocation5], 0 }
   0xb   :  { %23 = vsyncpa [#allocation5 + $0x1], 0 }
   0xc   :  { %24 = vsyncpa [#allocation8], 0  ;;  %s2385_s25 = smov 0   ;;  %s2387_s26 = smov 0  }
   0xd   :  { %s2389_s27 = smov 0   ;;  %s2391_s28 = smov 0  }
   0xe LB: > { %2862 = sst [smem:[#allocation13_spill]] %s2305_s27  ;;  %s2404_s29 = sadd.s32 4294967295, %s2309_s28   ;;  %s2309_s28 = sphi %s2391_s28, %s2880_s28   ;;  %s2305_s27 = sphi %s2389_s27, %s2882_s27   ;;  %s2301_s26 = sphi %s2387_s26, %s2884_s26   ;;  %s2297_s25 = sphi %s2385_s25, %s2883_s25  }
   0xf   : > { %p97_p0 = scmp.ne.s32.totalorder %s2301_s26, %s2297_s25  ;;  %p98_p1 = scmp.eq.s32.totalorder %s2404_s29, 0 }
  0x10   : > { %p1862_p2 = scmp.ge.s32.totalorder %s2309_s28, 1  ;;  %p374_p3 = scmp.lt.s32.totalorder %s2309_s28, 3 }
  0x11   : > { %p2412_p4 = por %p98_p1, %p97_p0  ;;  %s2864_s9 = sld [smem:[#allocation19_spill]] }
  0x12   : > { %p2419_p5 = pnand %p1862_p2, %p374_p3  ;;  %s2311_s18 = smov [#allocation7]  }
  0x13   : > { %s390_s19 = sshll.u32 %s2311_s18, 4  ;;  %s2432_s21 = sadd.s32 1, %s2309_s28   ;;  %s391_s19 = int_to_ptr.vmem [resolvable:$true] %s390_s19 }
  0x14   : > { %p2027_p6 = pneg %p2419_p5  ;;  %2867 = sst [smem:[#allocation14_spill]] %s2432_s21 }
  0x15   : > { %s2844_s22 = smov 128   ;;  %s2846_s23 = smov 8  }
  0x16   : > { %p2427_p7 = pnand %p2027_p6, %p98_p1  ;;  %s81_s24 = ssub.s32 %s2309_s28, %s2432_s21 }
  0x17   : > { %s388_s16 = sshll.u32 %s2864_s9, 4  ;;  %s84_s25 = sadd.s32 1, %s2305_s27  ;;  %s389_s16 = int_to_ptr.hbm [resolvable:$true] %s388_s16 }
  0x18   : > { %2030 = dma.hbm_to_vmem [thread:$0]  (!%p2427_p7), %s389_s16, 4096, %s391_s19, [#allocation8], %s2844_s22, %s2844_s22, %s2846_s23  }
  0x19   : > { %p82_p8 = scmp.eq.s32.totalorder %s81_s24, 0  ;;  %p91_p9 = scmp.ne.s32.totalorder %s2305_s27, %s2301_s26 }
  0x1a   : > { %p92_p10 = scmp.eq.s32.totalorder %s2309_s28, 0  ;;  %p2046_p11 = scmp.lt.s32.totalorder %s2309_s28, 2 }
  0x1b   : > { %s2447_s14 = scalar_select %p82_p8, %s2305_s27, %s84_s25  }
  0x1c   : > { %p93_p12 = por %p92_p10, %p91_p9  ;;  %s2450_s15 = sand.u32 1, %s2305_s27  }
  0x1d   : > { %2868 = sst [smem:[#allocation15_spill]] %s2447_s14  ;;  %s2851_s18 = smul.u32 192, %s2450_s15 }
  0x1e   : > { %s454_s9 = sand.u32 1, %s2309_s28   ;;  %s2852_s13 = smul.u32 192, %s2309_s28 }
  0x1f   : > { %p2455_p13 = pnand %p2046_p11, %p93_p12  ;;  %s2870_s3 = sld [smem:[#allocation16_spill]] }
  0x20   : > { %s458_s22 = scalar_lea.vmem [#allocation4], %s2851_s18  ;;  %s2466_s14 = scalar_lea.sflag [#allocation5], %s454_s9 }
  0x21   : > { %s466_s23 = sshll.u32 %s458_s22, 4  ;;  %p2151_p2 = pneg %p2455_p13  ;;  %s467_s23 = int_to_ptr.vmem [resolvable:$true] %s466_s23 }
  0x25   : > { %s463_s24 = scalar_lea.hbm %s2870_s3, %s2852_s13 }
  0x26   : > { %s464_s25 = sshll.u32 %s463_s24, 4  ;;  %s2154_s24 = scalar_lea.hbm %s2870_s3, 384  ;;  %s465_s25 = int_to_ptr.hbm [resolvable:$true] %s464_s25 }
  0x27   : > { %s2147_s27 = sshra.s32 %s465_s25, 4  ;;  %s2148_s27 = int_to_ptr.hbm [resolvable:$true] %s2147_s27 }
  0x28   : > { %s2149_s21 = scalar_lea.hbm %s2148_s27, 192  ;;  %p2155_p8 = scmp.lt.s32.totalorder %s2148_s27, %s2870_s3 }
  0x29   : > { %p2150_p0 = scmp.ne.s32.totalorder %s2148_s27, %s2149_s21  ;;  %p2156_p9 = scmp.lt.s32.totalorder %s2154_s24, %s2149_s21 }
  0x2b   : > { %p2152_p3 = pnand %p2151_p2, %p2150_p0  ;;  %p2157_p10 = por %p2156_p9, %p2155_p8 }
  0x2d   : > { %p2153_p6 = pneg %p2152_p3 }
  0x2f   : > { %p2158_p11 = pnand %p2157_p10, %p2153_p6 }
  0x31   : > { %2161 = shalt.err (!%p2158_p11)
}
  0x32   : > { %s2871_s9 = smov 8   ;;  %s2872_s13 = smov 128  }
  0x33   : > { %2040 = dma.hbm_to_vmem [thread:$0]  (!%p2455_p13), %s465_s25, 3072, %s467_s23, %s2466_s14, %s2872_s13, %s2872_s13, %s2871_s9  }
  0x34   : > { %s2873_s10 = sld [smem:[#allocation20_spill]]  ;;  %s2314_s27 = smov [#allocation9]  }
  0x35   : > { %s404_s21 = sshll.u32 %s2314_s27, 4  ;;  %s2874_s24 = smul.u32 192, %s2309_s28  ;;  %s405_s21 = int_to_ptr.vmem [resolvable:$true] %s404_s21 }
  0x36   : > { %s2875_s25 = smul.u32 192, %s2450_s15  ;;  %s433_s19 = scalar_lea.sflag [#allocation3], %s2450_s15 }
  0x37   : > { %s441_s6 = scalar_lea.hbm %s2832_s2, %s2874_s24  ;;  %s2214_s3 = scalar_lea.hbm %s2832_s2, 384 }
  0x38   : > { %s442_s23 = sshll.u32 %s441_s6, 4  ;;  %s436_s12 = scalar_lea.vmem [#allocation2], %s2875_s25  ;;  %s443_s23 = int_to_ptr.hbm [resolvable:$true] %s442_s23 }
  0x39   : > { %s444_s16 = sshll.u32 %s436_s12, 4  ;;  %s445_s16 = int_to_ptr.vmem [resolvable:$true] %s444_s16 }
  0x3a   : > { %s402_s18 = sshll.u32 %s2873_s10, 4  ;;  %s2207_s10 = sshra.s32 %s443_s23, 4  ;;  %s403_s18 = int_to_ptr.hbm [resolvable:$true] %s402_s18  ;;  %s2208_s10 = int_to_ptr.hbm [resolvable:$true] %s2207_s10 }
  0x3b   : > { %2033 = dma.hbm_to_vmem [thread:$0]  (!%p2427_p7), %s403_s18, 4096, %s405_s21, [#allocation8], %s2872_s13, %s2872_s13, %s2871_s9  }
  0x3c   : > { %s2209_s27 = scalar_lea.hbm %s2208_s10, 192  ;;  %p2215_p3 = scmp.lt.s32.totalorder %s2208_s10, %s2832_s2 }
  0x3d   : > { %p2210_p12 = scmp.ne.s32.totalorder %s2208_s10, %s2209_s27  ;;  %p2216_p6 = scmp.lt.s32.totalorder %s2214_s3, %s2209_s27 }
  0x3f   : > { %p2212_p0 = pnand %p2210_p12, %p2151_p2  ;;  %p2217_p8 = por %p2216_p6, %p2215_p3 }
  0x41   : > { %p2213_p7 = pneg %p2212_p0 }
  0x43   : > { %p2218_p9 = pnand %p2217_p8, %p2213_p7 }
  0x45   : > { %2221 = shalt.err (!%p2218_p9)
}
  0x46   : > { %2037 = dma.hbm_to_vmem [thread:$0]  (!%p2455_p13), %s443_s23, 3072, %s445_s16, %s433_s19, %s2872_s13, %s2872_s13, %s2871_s9  }
  0x47   : > { %s1868_s12 = sshll.u32 %s2450_s15, 9  ;;  %s2006_s24 = sshll.u32 %s2309_s28, 9 }
  0x48   : > { %s503_s20 = scalar_lea.hbm %s2837_s7, %s2006_s24  ;;  %s498_s27 = scalar_lea.vmem [#allocation6], %s1868_s12 }
  0x49   : > { %s504_s10 = sshll.u32 %s503_s20, 4  ;;  %s506_s18 = sshll.u32 %s498_s27, 4  ;;  %s505_s10 = int_to_ptr.hbm [resolvable:$true] %s504_s10  ;;  %s507_s18 = int_to_ptr.vmem [resolvable:$true] %s506_s18 }
  0x4a   : > { %s2237_s3 = sshra.s32 %s505_s10, 4  ;;  %s2244_s28 = scalar_lea.hbm %s2837_s7, 1024  ;;  %s2238_s3 = int_to_ptr.hbm [resolvable:$true] %s2237_s3 }
  0x4b   : > { %s2239_s21 = scalar_lea.hbm %s2238_s3, 512  ;;  %p2245_p0 = scmp.lt.s32.totalorder %s2238_s3, %s2837_s7 }
  0x4c   : > { %p2240_p10 = scmp.ne.s32.totalorder %s2238_s3, %s2239_s21  ;;  %p2246_p7 = scmp.lt.s32.totalorder %s2244_s28, %s2239_s21 }
  0x4e   : > { %p2242_p11 = pnand %p2240_p10, %p2151_p2  ;;  %p2247_p3 = por %p2246_p7, %p2245_p0 }
  0x50   : > { %p2243_p12 = pneg %p2242_p11 }
  0x52   : > { %p2248_p6 = pnand %p2247_p3, %p2243_p12 }
  0x54   : > { %2251 = shalt.err (!%p2248_p6)
}
  0x55   : > { %2043 = dma.hbm_to_vmem [thread:$0]  (!%p2455_p13), %s505_s10, 8192, %s507_s18, %s2466_s14, %s2872_s13, %s2872_s13, %s2871_s9  }
  0x56   : > { %524 = sbr.rel (%p2419_p5) target bundleno = 1344 (0x540), region = 72  ;;  %s526_s6 = sand.u32 (!%p2419_p5), 1, %s2301_s26  }
  0x57   : > { %s2011_s12 = smul.u32 (!%p2419_p5), 192, %s526_s6  ;;  %s527_s24 = scalar_lea.sflag (!%p2419_p5), [#allocation3], %s526_s6 }
  0x59   : > { %s2538_s22 = scalar_lea.vmem (!%p2419_p5), [#allocation2], %s2011_s12 }
  0x5b   : > { %2284 = dma.done.wait (%p2412_p4), %s527_s24, 3072  }
  0x5c   : > { %2286 = vsyncadd (%p2412_p4), %s527_s24, 4294964224  ;;  %s536_s8 = sand.u32 1, %s2404_s29   ;;  %s2545_s13 = scalar_lea.vmem [#allocation4], %s2011_s12 }
  0x5d   : > { %s537_s25 = scalar_lea.sflag [#allocation5], %s536_s8 }
  0x5e   : > { %2288 = dma.done.wait (%p2412_p4), %s537_s25, 11264  }
  0x5f   : > { %2290 = vsyncadd (%p2412_p4), %s537_s25, 4294956032  ;;  %s1872_s17 = sshll.u32 %s526_s6, 9 }
  0x60   : > { %s2551_s14 = scalar_lea.vmem [#allocation6], %s1872_s17 }
  0x61   : > { %2292 = dma.done.wait (%p98_p1), [#allocation8], 8192  }
  0x62   : > { %2294 = vsyncadd (%p98_p1), [#allocation8], 4294959104  ;;  %p630_p5 = scmp.lt.s32.totalorder %s2404_s29, 1  ;;  %v651_v2 = vld [vmem:[%s2830_s0] sm:$0xff]  ;;  %vm754_vm0 = vcmask 1043456   ;;  %v652_v3 = vld [vmem:[%s2830_s0 + $0x8] sm:$0xff] }
  0x63   : > { %v755_v4 = vrot.slane %v651_v2, 4  ;;  %vm666_vm1 = vcmask 1045504   ;;  %v667_v7 = vrot.slane %v651_v2, 2  ;;  %vm676_vm2 = vcmask 130048   ;;  %v653_v12 = vld [vmem:[%s2830_s0 + $0x10] sm:$0xff]  ;;  %v654_v19 = vld [vmem:[%s2830_s0 + $0x18] sm:$0xff] }
  0x64   : > { %s2886_s29 = smov (!%p630_p5, %s2404_s29), 1  ;;  %v756_v8 = vrot.slane %v652_v3, 4  ;;  %v668_v11 = vrot.slane %v652_v3, 2  ;;  %v758_v15 = vrot.slane %v653_v12, 4  ;;  %v670_v16 = vrot.slane %v653_v12, 2  ;;  %v916_v29 = vld [vmem:[#allocation7 + $0x78] sm:$0xff] }
  0x65   : > { %s2012_s9 = smul.u32 48, %s2886_s29  ;;  %s637_s19 = scalar_lea.vmem %s2834_s4, %s2886_s29  ;;  %v760_v20 = vrot.slane %v654_v19, 4  ;;  %v672_v21 = vrot.slane %v654_v19, 2  ;;  %v655_v24 = vld [vmem:[%s2830_s0 + $0x20] sm:$0xf]  ;;  %v962_v30 = vld [vmem:[#allocation7 + $0xf8] sm:$0xff]  ;;  %917 = vmatpush.msra.mxu3 %v916_v29 }
  0x66   : > { %v757_v13 = vsel %vm754_vm0, %v755_v4, %v756_v8  ;;  %v669_v14 = vsel %vm666_vm1, %v667_v7, %v668_v11  ;;  %v759_v17 = vsel %vm754_vm0, %v756_v8, %v758_v15  ;;  %v671_v18 = vsel %vm666_vm1, %v668_v11, %v670_v16  ;;  %v915_v31 = vld [vmem:[#allocation7 + $0x70] sm:$0xff]  ;;  %v914_v33 = vld [vmem:[#allocation7 + $0x68] sm:$0xff]  ;;  %v913_v35 = vld [vmem:[#allocation7 + $0x60] sm:$0xff]  ;;  %s640_s6 = scalar_lea.vmem %s2835_s5, %s2886_s29  ;;  %s2876_s17 = sld [smem:[#allocation21_spill]] }
  0x67   : > { %s634_s30 = scalar_lea.vmem %s2831_s1, %s2012_s9  ;;  %v761_v22 = vsel %vm754_vm0, %v758_v15, %v760_v20  ;;  %v673_v23 = vsel %vm666_vm1, %v670_v16, %v672_v21  ;;  %v762_v25 = vrot.slane %v655_v24, 4  ;;  %v674_v26 = vrot.slane %v655_v24, 2  ;;  %v961_v32 = vld [vmem:[#allocation7 + $0xf0] sm:$0xff]  ;;  %918 = vmatpush.msra.mxu3 %v915_v31  ;;  %v960_v34 = vld [vmem:[#allocation7 + $0xe8] sm:$0xff]  ;;  %v959_v36 = vld [vmem:[#allocation7 + $0xe0] sm:$0xff]  ;;  %s2877_s21 = sld [smem:[#allocation17_spill]] }
  0x68   : > { %v1888_v0 = vld [vmem:[%s634_s30 + $0x28] sm:$0xff]  ;;  %v1887_v1 = vld [vmem:[%s634_s30 + $0x20] sm:$0xff]  ;;  %v1878_v5 = vld [vmem:[%s634_s30 + $0x18] sm:$0xff]  ;;  %s2879_s8 = sld [smem:[#allocation22_spill]] }
  0x69   : > { %786 = vmatpush.msra.mxu2 %v1888_v0  ;;  %v657_v6 = vld [vmem:[%s634_s30 + $0x8] sm:$0xff]  ;;  %699 = vmatpush.msra.mxu0 %v1878_v5  ;;  %v1877_v9 = vld [vmem:[%s634_s30 + $0x10] sm:$0xff]  ;;  %v656_v10 = vld [vmem:[%s634_s30] sm:$0xff]  ;;  %v763_v27 = vsel %vm754_vm0, %v760_v20, %v762_v25  ;;  %v675_v28 = vsel %vm666_vm1, %v672_v21, %v674_v26 }
  0x6a   : > { %736 = vmatpush.msra.mxu1 %v657_v6  ;;  %919 = vmatpush.msra.mxu3 %v914_v33  ;;  %v912_v37 = vld [vmem:[#allocation7 + $0x58] sm:$0xff]  ;;  %v911_v39 = vld [vmem:[#allocation7 + $0x50] sm:$0xff]  ;;  %v910_v41 = vld [vmem:[#allocation7 + $0x48] sm:$0xff] }
  0x6b   : > { %787 = vmatpush.msra.mxu2 %v1887_v1  ;;  %700 = vmatpush.msra.mxu0 %v1877_v9  ;;  %v958_v38 = vld [vmem:[#allocation7 + $0xd8] sm:$0xff]  ;;  %v957_v40 = vld [vmem:[#allocation7 + $0xd0] sm:$0xff]  ;;  %v956_v42 = vld [vmem:[#allocation7 + $0xc8] sm:$0xff] }
  0x6c   : > { %737 = vmatpush.msra.mxu1 %v656_v10  ;;  %1889 = vmatmul.msk.f32.vlgmr.msra.gmra.mxu2 %vm676_vm2, %v757_v13  ;;  %v909_v43 = vld [vmem:[#allocation7 + $0x40] sm:$0xff]  ;;  %v908_v45 = vld [vmem:[#allocation7 + $0x38] sm:$0xff]  ;;  %v907_v47 = vld [vmem:[#allocation7 + $0x30] sm:$0xff] }
  0x6d   : > { %1879 = vmatmul.msk.f32.vlgmr.msra.gmra.mxu0 %vm676_vm2, %v669_v14  ;;  %1883 = vmatmul.msk.f32.vlgmr.msra.gmra.mxu1 %vm676_vm2, %v651_v2  ;;  %v955_v44 = vld [vmem:[#allocation7 + $0xc0] sm:$0xff]  ;;  %v954_v46 = vld [vmem:[#allocation7 + $0xb8] sm:$0xff]  ;;  %v953_v48 = vld [vmem:[#allocation7 + $0xb0] sm:$0xff]  ;;  %s643_s23 = scalar_lea.vmem %s2877_s21, %s2886_s29 }
  0x6e   : > { %963 = vmatpush.msrb.mxu0 %v962_v30  ;;  %920 = vmatpush.msra.mxu3 %v913_v35  ;;  %v906_v49 = vld [vmem:[#allocation7 + $0x28] sm:$0xff]  ;;  %v905_v52 = vld [vmem:[#allocation7 + $0x20] sm:$0xff]  ;;  %v904_v55 = vld [vmem:[#allocation7 + $0x18] sm:$0xff] }
  0x6f   : > { %v952_v50 = vld [vmem:[#allocation7 + $0xa8] sm:$0xff]  ;;  %v951_v53 = vld [vmem:[#allocation7 + $0xa0] sm:$0xff]  ;;  %v950_v56 = vld [vmem:[#allocation7 + $0x98] sm:$0xff] }
  0x70   : > { %964 = vmatpush.msrb.mxu0 %v961_v32  ;;  %921 = vmatpush.msra.mxu3 %v912_v37  ;;  %v903_v58 = vld [vmem:[#allocation7 + $0x10] sm:$0xff]  ;;  %v2085_v60 = vld [vmem:[%s637_s19] ss:$0 sm:$0xff]  ;;  %v902_v62 = vld [vmem:[#allocation7 + $0x8] sm:$0xff]  ;;  %s2878_s19 = sld [smem:[#allocation18_spill]] }
  0x71   : > { %v949_v59 = vld [vmem:[#allocation7 + $0x90] sm:$0xff]  ;;  %v948_v63 = vld [vmem:[#allocation7 + $0x88] sm:$0xff]  ;;  %v901_v2 = vld [vmem:[#allocation7] sm:$0xff] }
  0x72   : > { %965 = vmatpush.msrb.mxu0 %v960_v34  ;;  %922 = vmatpush.msra.mxu3 %v911_v39 }
  0x74   : > { %1890 = vmatmul.msk.f32.gmra.mxu2 %vm676_vm2, %v759_v17  ;;  %966 = vmatpush.msrb.mxu0 %v959_v36 }
  0x75   : > { %1880 = vmatmul.msk.f32.gmra.mxu0 %vm676_vm2, %v671_v18  ;;  %1884 = vmatmul.msk.f32.gmra.mxu1 %vm676_vm2, %v652_v3  ;;  %v947_v3 = vld [vmem:[#allocation7 + $0x80] sm:$0xff] }
  0x76   : > { %967 = vmatpush.msrb.mxu0 %v958_v38  ;;  %923 = vmatpush.msra.mxu3 %v910_v41 }
  0x78   : > { %968 = vmatpush.msrb.mxu0 %v957_v40  ;;  %924 = vmatpush.msra.mxu3 %v909_v43 }
  0x7a   : > { %969 = vmatpush.msrb.mxu0 %v956_v42  ;;  %925 = vmatpush.msra.mxu3 %v908_v45 }
  0x7c   : > { %1891 = vmatmul.msk.f32.gmra.mxu2 %vm676_vm2, %v761_v22  ;;  %970 = vmatpush.msrb.mxu0 %v955_v44 }
  0x7d   : > { %1881 = vmatmul.msk.f32.gmra.mxu0 %vm676_vm2, %v673_v23  ;;  %1885 = vmatmul.msk.f32.gmra.mxu1 %vm676_vm2, %v653_v12 }
  0x7e   : > { %971 = vmatpush.msrb.mxu0 %v954_v46  ;;  %926 = vmatpush.msra.mxu3 %v907_v47 }
  0x80   : > { %972 = vmatpush.msrb.mxu0 %v953_v48  ;;  %927 = vmatpush.msra.mxu3 %v906_v49 }
  0x82   : > { %973 = vmatpush.msrb.mxu0 %v952_v50  ;;  %928 = vmatpush.msra.mxu3 %v905_v52 }
  0x84   : > { %1892 = vmatmul.msk.f32.gmra.mxu2 %vm676_vm2, %v763_v27  ;;  %974 = vmatpush.msrb.mxu0 %v951_v53 }
  0x85   : > { %1882 = vmatmul.msk.f32.gmra.mxu0 %vm676_vm2, %v675_v28  ;;  %1886 = vmatmul.msk.f32.gmra.mxu1 %vm676_vm2, %v654_v19 }
  0x86   : > { %929 = vmatpush.msra.mxu3 %v904_v55  ;;  %975 = vmatpush.msrb.mxu0 %v950_v56 }
  0x88   : > { %930 = vmatpush.msra.mxu3 %v903_v58  ;;  %976 = vmatpush.msrb.mxu0 %v949_v59 }
  0x8a   : > { %931 = vmatpush.msra.mxu3 %v902_v62  ;;  %977 = vmatpush.msrb.mxu0 %v948_v63 }
  0x8c   : > { %932 = vmatpush.msra.mxu3 %v901_v2  ;;  %978 = vmatpush.msrb.mxu0 %v947_v3 }
  0xea   : > { %v702_v51 = vpop.f32.mrf.mxu0  ;;  %v739_v54 = vpop.f32.mrf.mxu1 }
  0xeb   : > { %v740_v57 = vadd.f32 %v739_v54, %v702_v51 }
  0xef   : > { %v789_v61 = vpop.f32.mrf.mxu2 }
  0xf0   : > { %v801_v0 = vadd.f32 %v789_v61, %v740_v57 }
  0xf2   : > { %v705_v1 = vpop.f32.mrf.mxu0  ;;  %v809_v4 = vadd.f32 %v2085_v60, %v801_v0  ;;  %v742_v5 = vpop.f32.mrf.mxu1 }
  0xf3   : > { %v743_v7 = vadd.f32 %v742_v5, %v705_v1 }
  0xf4   : > { %v1893_v6 = vmul.f32 -1.442695, %v809_v4  ;;  %vm813_vm7 = vcmp.lt.f32.partialorder %v809_v4, 10.0 }
  0xf6   : > { %2089 = vpow2.f32 %v1893_v6 }
  0xf7   : > { %v792_v8 = vpop.f32.mrf.mxu2 }
  0xf8   : > { %v802_v9 = vadd.f32 %v792_v8, %v743_v7 }
  0xfa   : > { %v708_v10 = vpop.f32.mrf.mxu0  ;;  %v2609_v11 = vadd.f32 %v2085_v60, %v802_v9  ;;  %v745_v12 = vpop.f32.mrf.mxu1 }
  0xfb   : > { %v746_v15 = vadd.f32 %v745_v12, %v708_v10 }
  0xfc   : > { %v2090_v13 = vpop.eup %2089  ;;  %v1894_v14 = vmul.f32 -1.442695, %v2609_v11  ;;  %vm814_vm12 = vcmp.lt.f32.partialorder %v2609_v11, 10.0 }
  0xfd   : > { %v829_v16 = vadd.f32 1.0, %v2090_v13 }
  0xfe   : > { %2091 = vpow2.f32 %v1894_v14 }
  0xff   : > { %2093 = vrcp.f32 %v829_v16  ;;  %v795_v17 = vpop.f32.mrf.mxu2  ;;  %v844_v31 = vand.u32 2147483648, %v829_v16  ;;  %v842_v34 = vand.u32 2147483647, %v829_v16  ;;  %vm838_vm4 = vweird.f32 %v829_v16 }
 0x100   : > { %v803_v18 = vadd.f32 %v795_v17, %v746_v15 }
 0x101   : > { %v845_v40 = vor.u32 1.1754944e-38, %v844_v31  ;;  %vm843_vm6 = vcmp.eq.f32.partialorder %v842_v34, 8.507059e+37  ;;  %v1900_v31 = vld [vmem:[%s2841_s11 + $0x18] sm:$0xff]  ;;  %v1083_v34 = vld [vmem:[%s2538_s22 + $0x30] sm:$0xff] }
 0x102   : > { %v711_v19 = vpop.f32.mrf.mxu0  ;;  %v2612_v20 = vadd.f32 %v2085_v60, %v803_v18  ;;  %v748_v21 = vpop.f32.mrf.mxu1 }
 0x103   : > { %v749_v24 = vadd.f32 %v748_v21, %v711_v19 }
 0x104   : > { %v2092_v22 = vpop.eup %2091  ;;  %v1895_v23 = vmul.f32 -1.442695, %v2612_v20 }
 0x105   : > { %v2094_v25 = vpop.eup %2093  ;;  %v830_v26 = vadd.f32 1.0, %v2092_v22 }
 0x106   : > { %2095 = vpow2.f32 %v1895_v23  ;;  %v834_v27 = vmul.f32 %v2094_v25, %v829_v16  ;;  %vm839_vm3 = vweird.f32 %v2094_v25 }
 0x107   : > { %2097 = vrcp.f32 %v830_v26  ;;  %v798_v28 = vpop.f32.mrf.mxu2  ;;  %vm840_vm5 = vmor %vm838_vm4, %vm839_vm3  ;;  %v859_v46 = vand.u32 2147483648, %v830_v26  ;;  %v857_v49 = vand.u32 2147483647, %v830_v26  ;;  %vm853_vm9 = vweird.f32 %v830_v26 }
 0x108   : > { %v804_v29 = vadd.f32 %v798_v28, %v749_v24  ;;  %v835_v30 = vsub.f32 1.0, %v834_v27  ;;  %vm815_vm4 = vcmp.lt.f32.partialorder %v2612_v20, 10.0  ;;  %v1925_v24 = vld [vmem:[%s2538_s22 + $0xb8] sm:$0xff] }
 0x109   : > { %v860_v54 = vor.u32 1.1754944e-38, %v859_v46  ;;  %vm858_vm11 = vcmp.eq.f32.partialorder %v857_v49, 8.507059e+37  ;;  %1183 = vmatpush.msrb.mxu3 %v1925_v24  ;;  %v1912_v46 = vld [vmem:[%s2538_s22 + $0x70] sm:$0xff]  ;;  %v1922_v49 = vld [vmem:[%s2538_s22 + $0xa0] sm:$0xff]  ;;  %v1301_v24 = vld [vmem:[#allocation9 + $0xd8] sm:$0xff] }
 0x10a   : > { %v2615_v32 = vadd.f32 %v2085_v60, %v804_v29  ;;  %v836_v33 = vmul.f32 %v2094_v25, %v835_v30 }
 0x10c   : > { %v2096_v35 = vpop.eup %2095  ;;  %v1896_v36 = vmul.f32 -1.442695, %v2615_v32  ;;  %v837_v37 = vadd.f32 %v2094_v25, %v836_v33  ;;  %v1084_v33 = vld [vmem:[%s2538_s22 + $0x38] sm:$0xff] }
 0x10d   : > { %v2098_v38 = vpop.eup %2097  ;;  %v831_v39 = vadd.f32 1.0, %v2096_v35  ;;  %v1901_v35 = vld [vmem:[%s2841_s11 + $0x20] sm:$0xff] }
 0x10e   : > { %2099 = vpow2.f32 %v1896_v36  ;;  %v841_v41 = vsel %vm840_vm5, %v2094_v25, %v837_v37  ;;  %v849_v42 = vmul.f32 %v2098_v38, %v830_v26  ;;  %vm854_vm8 = vweird.f32 %v2098_v38  ;;  %v997_v36 = vld [vmem:[%s2841_s11 + $0x8] sm:$0xff] }
 0x10f   : > { %2101 = vrcp.f32 %v831_v39  ;;  %v846_v43 = vsel %vm843_vm6, %v845_v40, %v841_v41  ;;  %vm855_vm10 = vmor %vm853_vm9, %vm854_vm8  ;;  %v874_v60 = vand.u32 2147483648, %v831_v39  ;;  %v872_v63 = vand.u32 2147483647, %v831_v39  ;;  %v1902_v37 = vld [vmem:[%s2841_s11 + $0x28] sm:$0xf]  ;;  %v1081_v40 = vld [vmem:[%s2538_s22 + $0x20] sm:$0xff] }
 0x110   : > { %v893_v44 = vmul.f32 %v846_v43, %v809_v4  ;;  %v850_v45 = vsub.f32 1.0, %v849_v42  ;;  %vm868_vm14 = vweird.f32 %v831_v39  ;;  %vm816_vm9 = vcmp.lt.f32.partialorder %v2615_v32, 10.0  ;;  %v1080_v41 = vld [vmem:[%s2538_s22 + $0x18] sm:$0xff]  ;;  %v1079_v42 = vld [vmem:[%s2538_s22 + $0x10] sm:$0xff] }
 0x111   : > { %v875_v2 = vor.u32 1.1754944e-38, %v874_v60  ;;  %vm873_vm3 = vcmp.eq.f32.partialorder %v872_v63, 8.507059e+37  ;;  %v1913_v43 = vld [vmem:[%s2538_s22 + $0x78] sm:$0xff] }
 0x112   : > { %v897_v47 = vsel %vm813_vm7, %v893_v44, 10.0  ;;  %v851_v48 = vmul.f32 %v2098_v38, %v850_v45  ;;  %v1078_v44 = vld [vmem:[%s2538_s22 + $0x8] sm:$0xff]  ;;  %v1924_v45 = vld [vmem:[%s2538_s22 + $0xb0] sm:$0xff] }
 0x113   : > { %933 = vmatmul.f32.vlgmr.msra.gmra.mxu3 %v897_v47  ;;  %979 = vmatmul.f32.vlgmr.msrb.gmra.mxu0 %v897_v47  ;;  %v1077_v47 = vld [vmem:[%s2538_s22] sm:$0xff] }
 0x114   : > { %v2100_v50 = vpop.eup %2099  ;;  %v852_v51 = vadd.f32 %v2098_v38, %v851_v48  ;;  %1184 = vmatpush.msrb.mxu3 %v1924_v45  ;;  %v1923_v48 = vld [vmem:[%s2538_s22 + $0xa8] sm:$0xff] }
 0x115   : > { %v2102_v52 = vpop.eup %2101  ;;  %v832_v53 = vadd.f32 1.0, %v2100_v50  ;;  %v1911_v50 = vld [vmem:[%s2538_s22 + $0x68] sm:$0xff] }
 0x116   : > { %v856_v55 = vsel %vm855_vm10, %v2098_v38, %v852_v51  ;;  %v864_v56 = vmul.f32 %v2102_v52, %v831_v39  ;;  %vm869_vm13 = vweird.f32 %v2102_v52  ;;  %vm999_vm10 = vcmask 261120   ;;  %v998_v38 = vld [vmem:[%s2841_s11 + $0x10] sm:$0xf]  ;;  %v1082_v39 = vld [vmem:[%s2538_s22 + $0x28] sm:$0xff]  ;;  %1185 = vmatpush.msrb.mxu3 %v1923_v48  ;;  %v1921_v51 = vld [vmem:[%s2538_s22 + $0x98] sm:$0xff] }
 0x117   : > { %2103 = vrcp.f32 %v832_v53  ;;  %v861_v57 = vsel %vm858_vm11, %v860_v54, %v856_v55  ;;  %vm870_vm15 = vmor %vm868_vm14, %vm869_vm13  ;;  %v889_v8 = vand.u32 2147483648, %v832_v53  ;;  %vm883_vm6 = vweird.f32 %v832_v53  ;;  %v1920_v54 = vld [vmem:[%s2538_s22 + $0x90] sm:$0xff]  ;;  %v1291_v48 = vld [vmem:[#allocation9 + $0x88] sm:$0xff] }
 0x118   : > { %v894_v58 = vmul.f32 %v861_v57, %v2609_v11  ;;  %v865_v59 = vsub.f32 1.0, %v864_v56  ;;  %v887_v11 = vand.u32 2147483647, %v832_v53  ;;  %1186 = vmatpush.msrb.mxu3 %v1922_v49  ;;  %v1908_v55 = vld [vmem:[%s2538_s22 + $0x50] sm:$0xff]  ;;  %v1919_v56 = vld [vmem:[%s2538_s22 + $0x88] sm:$0xff]  ;;  %v1918_v57 = vld [vmem:[%s2538_s22 + $0x80] sm:$0xff] }
 0x119   : > { %v890_v13 = vor.u32 1.1754944e-38, %v889_v8  ;;  %vm1102_vm11 = vcmask 523264  }
 0x11a   : > { %v898_v61 = vsel %vm814_vm12, %v894_v58, 10.0  ;;  %v866_v62 = vmul.f32 %v2102_v52, %v865_v59  ;;  %vm888_vm8 = vcmp.eq.f32.partialorder %v887_v11, 8.507059e+37  ;;  %1187 = vmatpush.msrb.mxu3 %v1921_v51  ;;  %v1907_v58 = vld [vmem:[%s2538_s22 + $0x48] sm:$0xff]  ;;  %v1906_v59 = vld [vmem:[%s2538_s22 + $0x40] sm:$0xff] }
 0x11b   : > { %936 = vmatmul.f32.gmra.mxu3 %v898_v61  ;;  %982 = vmatmul.f32.gmra.mxu0 %v898_v61  ;;  %v1250_v51 = vld [vmem:[#allocation9] sm:$0xff] }
 0x11c   : > { %v867_v0 = vadd.f32 %v2102_v52, %v866_v62  ;;  %1188 = vmatpush.msrb.mxu3 %v1920_v54 }
 0x11d   : > { %v2104_v1 = vpop.eup %2103 }
 0x11e   : > { %v871_v3 = vsel %vm870_vm15, %v2102_v52, %v867_v0  ;;  %v879_v4 = vmul.f32 %v2104_v1, %v832_v53  ;;  %vm884_vm5 = vweird.f32 %v2104_v1  ;;  %v1910_v52 = vld [vmem:[%s2538_s22 + $0x60] sm:$0xff]  ;;  %v1909_v53 = vld [vmem:[%s2538_s22 + $0x58] sm:$0xff]  ;;  %1189 = vmatpush.msrb.mxu3 %v1919_v56  ;;  %s646_s22 = scalar_lea.vmem %s2878_s19, %s2886_s29 }
 0x11f   : > { %v876_v5 = vsel %vm873_vm3, %v875_v2, %v871_v3  ;;  %vm885_vm7 = vmor %vm883_vm6, %vm884_vm5 }
 0x120   : > { %v895_v6 = vmul.f32 %v876_v5, %v2612_v20  ;;  %v880_v7 = vsub.f32 1.0, %v879_v4  ;;  %1190 = vmatpush.msrb.mxu3 %v1918_v57 }
 0x122   : > { %v899_v9 = vsel %vm815_vm4, %v895_v6, 10.0  ;;  %v881_v10 = vmul.f32 %v2104_v1, %v880_v7 }
 0x123   : > { %939 = vmatmul.f32.gmra.mxu3 %v899_v9  ;;  %985 = vmatmul.f32.gmra.mxu0 %v899_v9 }
 0x124   : > { %v882_v12 = vadd.f32 %v2104_v1, %v881_v10 }
 0x126   : > { %v886_v14 = vsel %vm885_vm7, %v2104_v1, %v882_v12 }
 0x127   : > { %v891_v15 = vsel %vm888_vm8, %v890_v13, %v886_v14 }
 0x128   : > { %v896_v16 = vmul.f32 %v891_v15, %v2615_v32  ;;  %v996_v32 = vld [vmem:[%s2841_s11] sm:$0xff]  ;;  %v1265_v15 = vld [vmem:[#allocation9 + $0x78] sm:$0xff] }
 0x129   : > { %1266 = vmatpush.msra.mxu0 %v1265_v15 }
 0x12a   : > { %v900_v17 = vsel %vm816_vm9, %v896_v16, 10.0  ;;  %v1305_v16 = vld [vmem:[#allocation9 + $0xf8] sm:$0xff] }
 0x12b   : > { %942 = vmatmul.f32.gmra.mxu3 %v900_v17  ;;  %988 = vmatmul.f32.gmra.mxu0 %v900_v17  ;;  %v1264_v17 = vld [vmem:[#allocation9 + $0x70] sm:$0xff] }
 0x12c   : > { %1267 = vmatpush.msra.mxu0 %v1264_v17 }
 0x190   : > { %v980_v18 = vpop.f32.mrf.mxu0 }
 0x196   : > { %v934_v19 = vpop.f32.mrf.mxu3 }
 0x197   : > { %v992_v30 = vmax.f32 %v934_v19, %v980_v18  ;;  %v1304_v18 = vld [vmem:[#allocation9 + $0xf0] sm:$0xff]  ;;  %v1263_v19 = vld [vmem:[#allocation9 + $0x68] sm:$0xff] }
 0x198   : > { %v983_v20 = vpop.f32.mrf.mxu0  ;;  %1268 = vmatpush.msra.mxu0 %v1263_v19 }
 0x19e   : > { %v937_v21 = vpop.f32.mrf.mxu3 }
 0x19f   : > { %v993_v29 = vmax.f32 %v937_v21, %v983_v20  ;;  %v1303_v20 = vld [vmem:[#allocation9 + $0xe8] sm:$0xff]  ;;  %v1262_v21 = vld [vmem:[#allocation9 + $0x60] sm:$0xff] }
 0x1a0   : > { %v986_v22 = vpop.f32.mrf.mxu0  ;;  %1269 = vmatpush.msra.mxu0 %v1262_v21 }
 0x1a6   : > { %v940_v23 = vpop.f32.mrf.mxu3 }
 0x1a7   : > { %v994_v28 = vmax.f32 %v940_v23, %v986_v22  ;;  %v1302_v22 = vld [vmem:[#allocation9 + $0xe0] sm:$0xff]  ;;  %v1261_v23 = vld [vmem:[#allocation9 + $0x58] sm:$0xff] }
 0x1a8   : > { %v989_v25 = vpop.f32.mrf.mxu0  ;;  %1270 = vmatpush.msra.mxu0 %v1261_v23 }
 0x1ae   : > { %v943_v26 = vpop.f32.mrf.mxu3 }
 0x1af   : > { %v995_v27 = vmax.f32 %v943_v26, %v989_v25  ;;  %v1260_v25 = vld [vmem:[#allocation9 + $0x50] sm:$0xff] }
 0x1b0   : > { %v1300_v26 = vld [vmem:[#allocation9 + $0xd0] sm:$0xff]  ;;  %1271 = vmatpush.msra.mxu0 %v1260_v25 }
 0x1b1   : > { %1021 = vmatpush.msrb.mxu1 %v995_v27  ;;  %1060 = vmatpush.msrb.mxu2 %v995_v27  ;;  %v1259_v27 = vld [vmem:[#allocation9 + $0x48] sm:$0xff] }
 0x1b2   : > { %1272 = vmatpush.msra.mxu0 %v1259_v27 }
 0x1b3   : > { %1022 = vmatpush.msrb.mxu1 %v994_v28  ;;  %1061 = vmatpush.msrb.mxu2 %v994_v28  ;;  %v1299_v28 = vld [vmem:[#allocation9 + $0xc8] sm:$0xff] }
 0x1b5   : > { %1023 = vmatpush.msrb.mxu1 %v993_v29  ;;  %1062 = vmatpush.msrb.mxu2 %v993_v29  ;;  %v1258_v29 = vld [vmem:[#allocation9 + $0x40] sm:$0xff] }
 0x1b6   : > { %1273 = vmatpush.msra.mxu0 %v1258_v29 }
 0x1b7   : > { %1024 = vmatpush.msrb.mxu1 %v992_v30  ;;  %1063 = vmatpush.msrb.mxu2 %v992_v30  ;;  %v1298_v30 = vld [vmem:[#allocation9 + $0xc0] sm:$0xff] }
 0x1b8   : > { %1903 = vmatmul.msk.f32.vlgmr.msrb.gmra.mxu2 %vm999_vm10, %v1900_v31  ;;  %1897 = vmatmul.msk.f32.vlgmr.msrb.gmra.mxu1 %vm999_vm10, %v996_v32  ;;  %v1257_v31 = vld [vmem:[#allocation9 + $0x38] sm:$0xff] }
 0x1b9   : > { %1142 = vmatpush.msra.mxu2 %v1084_v33  ;;  %1115 = vmatpush.msra.mxu1 %v1913_v43  ;;  %v1297_v32 = vld [vmem:[#allocation9 + $0xb8] sm:$0xff]  ;;  %v1256_v33 = vld [vmem:[#allocation9 + $0x30] sm:$0xff] }
 0x1ba   : > { %1274 = vmatpush.msra.mxu0 %v1257_v31  ;;  %v1252_v43 = vld [vmem:[#allocation9 + $0x10] sm:$0xff] }
 0x1bb   : > { %1143 = vmatpush.msra.mxu2 %v1083_v34  ;;  %1116 = vmatpush.msra.mxu1 %v1912_v46  ;;  %v1296_v34 = vld [vmem:[#allocation9 + $0xb0] sm:$0xff]  ;;  %v2086_v46 = vld [vmem:[%s640_s6] ss:$0 sm:$0xff]  ;;  %s1876_s6 = sshll.u32 %s2886_s29, 1 }
 0x1bc   : > { %1275 = vmatpush.msra.mxu0 %v1256_v33  ;;  %v1932_v33 = vld [vmem:[%s2876_s17 + $0x10] sm:$0xff]  ;;  %s650_s25 = scalar_lea.vmem %s2879_s8, %s1876_s6 }
 0x1bd   : > { %1144 = vmatpush.msra.mxu2 %v1082_v39  ;;  %1117 = vmatpush.msra.mxu1 %v1911_v50 }
 0x1bf   : > { %1145 = vmatpush.msra.mxu2 %v1081_v40  ;;  %1118 = vmatpush.msra.mxu1 %v1910_v52  ;;  %v1253_v40 = vld [vmem:[#allocation9 + $0x18] sm:$0xff]  ;;  %v1290_v52 = vld [vmem:[#allocation9 + $0x80] sm:$0xff] }
 0x1c0   : > { %1904 = vmatmul.msk.f32.gmra.mxu2 %vm999_vm10, %v1901_v35  ;;  %1898 = vmatmul.msk.f32.gmra.mxu1 %vm999_vm10, %v997_v36  ;;  %v1255_v35 = vld [vmem:[#allocation9 + $0x28] sm:$0xff] }
 0x1c1   : > { %1146 = vmatpush.msra.mxu2 %v1080_v41  ;;  %1119 = vmatpush.msra.mxu1 %v1909_v53  ;;  %v1295_v36 = vld [vmem:[#allocation9 + $0xa8] sm:$0xff]  ;;  %v1293_v41 = vld [vmem:[#allocation9 + $0x98] sm:$0xff] }
 0x1c2   : > { %1276 = vmatpush.msra.mxu0 %v1255_v35  ;;  %v1953_v35 = vld [vmem:[%s2545_s13 + $0xb8] sm:$0xff] }
 0x1c3   : > { %1147 = vmatpush.msra.mxu2 %v1079_v42  ;;  %1120 = vmatpush.msra.mxu1 %v1908_v55 }
 0x1c5   : > { %1148 = vmatpush.msra.mxu2 %v1078_v44  ;;  %1121 = vmatpush.msra.mxu1 %v1907_v58  ;;  %v1292_v44 = vld [vmem:[#allocation9 + $0x90] sm:$0xff] }
 0x1c7   : > { %1149 = vmatpush.msra.mxu2 %v1077_v47  ;;  %1122 = vmatpush.msra.mxu1 %v1906_v59  ;;  %v1251_v47 = vld [vmem:[#allocation9 + $0x8] sm:$0xff] }
 0x1c8   : > { %1905 = vmatmul.msk.f32.gmra.mxu2 %vm999_vm10, %v1902_v37  ;;  %1899 = vmatmul.msk.f32.gmra.mxu1 %vm999_vm10, %v998_v38  ;;  %v1254_v37 = vld [vmem:[#allocation9 + $0x20] sm:$0xff] }
 0x1c9   : > { %1306 = vmatpush.msrb.mxu1 %v1305_v16  ;;  %v1294_v38 = vld [vmem:[#allocation9 + $0xa0] sm:$0xff]  ;;  %1277 = vmatpush.msra.mxu0 %v1254_v37  ;;  %v1332_v37 = vld [vmem:[%s2876_s17 + $0x8] sm:$0xf] }
 0x1cb   : > { %1307 = vmatpush.msrb.mxu1 %v1304_v18  ;;  %1278 = vmatpush.msra.mxu0 %v1253_v40  ;;  %v1400_v40 = vld [vmem:[%s2545_s13 + $0x20] sm:$0xff] }
 0x1cd   : > { %1308 = vmatpush.msrb.mxu1 %v1303_v20  ;;  %1279 = vmatpush.msra.mxu0 %v1252_v43  ;;  %v1943_v43 = vld [vmem:[%s2545_s13 + $0x78] sm:$0xff] }
 0x1cf   : > { %1309 = vmatpush.msrb.mxu1 %v1302_v22  ;;  %1280 = vmatpush.msra.mxu0 %v1251_v47  ;;  %v1396_v47 = vld [vmem:[%s2545_s13] sm:$0xff] }
 0x1d1   : > { %1310 = vmatpush.msrb.mxu1 %v1301_v24  ;;  %1281 = vmatpush.msra.mxu0 %v1250_v51  ;;  %v1949_v51 = vld [vmem:[%s2545_s13 + $0x98] sm:$0xff] }
 0x1d3   : > { %1311 = vmatpush.msrb.mxu1 %v1300_v26  ;;  %1428 = vmatpush.msrb.mxu0 %v1943_v43  ;;  %v1979_v43 = vld [vmem:[%s2551_s14 + $0x138] sm:$0xff] }
 0x1d5   : > { %1312 = vmatpush.msrb.mxu1 %v1299_v28 }
 0x1d7   : > { %1313 = vmatpush.msrb.mxu1 %v1298_v30 }
 0x1d9   : > { %1314 = vmatpush.msrb.mxu1 %v1297_v32  ;;  %v1331_v32 = vld [vmem:[%s2876_s17] sm:$0xff] }
 0x1db   : > { %1315 = vmatpush.msrb.mxu1 %v1296_v34  ;;  %v1403_v34 = vld [vmem:[%s2545_s13 + $0x38] sm:$0xff] }
 0x1dd   : > { %1316 = vmatpush.msrb.mxu1 %v1295_v36  ;;  %v1402_v36 = vld [vmem:[%s2545_s13 + $0x30] sm:$0xff] }
 0x1df   : > { %1317 = vmatpush.msrb.mxu1 %v1294_v38  ;;  %v1933_v38 = vld [vmem:[%s2876_s17 + $0x18] sm:$0xf] }
 0x1e1   : > { %1318 = vmatpush.msrb.mxu1 %v1293_v41  ;;  %v1399_v41 = vld [vmem:[%s2545_s13 + $0x18] sm:$0xff] }
 0x1e3   : > { %1319 = vmatpush.msrb.mxu1 %v1292_v44  ;;  %v1397_v44 = vld [vmem:[%s2545_s13 + $0x8] sm:$0xff] }
 0x1e5   : > { %1320 = vmatpush.msrb.mxu1 %v1291_v48  ;;  %v1951_v48 = vld [vmem:[%s2545_s13 + $0xa8] sm:$0xff] }
 0x1e7   : > { %1321 = vmatpush.msrb.mxu1 %v1290_v52  ;;  %v1940_v52 = vld [vmem:[%s2545_s13 + $0x60] sm:$0xff] }
 0x235   : > { %v1026_v60 = vpop.f32.mrf.mxu1 }
 0x23b   : > { %v1065_v61 = vpop.f32.mrf.mxu2 }
 0x23c   : > { %v1074_v62 = vmax.f32 %v1026_v60, %v1065_v61 }
 0x23d   : > { %v1029_v63 = vpop.f32.mrf.mxu1 }
 0x23e   : > { %1916 = vmatmul.msk.f32.vlgmr.msra.gmra.mxu2 %vm1102_vm11, %v1074_v62  ;;  %v1097_v2 = vrot.slane %v1074_v62, 2  ;;  %v1166_v3 = vrot.slane %v1074_v62, 4 }
 0x243   : > { %v1068_v0 = vpop.f32.mrf.mxu2 }
 0x244   : > { %v1075_v1 = vmax.f32 %v1029_v63, %v1068_v0 }
 0x245   : > { %v1032_v8 = vpop.f32.mrf.mxu1 }
 0x246   : > { %v1098_v4 = vrot.slane %v1075_v1, 2  ;;  %v1167_v5 = vrot.slane %v1075_v1, 4  ;;  %1917 = vmatmul.msk.f32.gmra.mxu2 %vm1102_vm11, %v1075_v1 }
 0x248   : > { %v1168_v6 = vsel %vm754_vm0, %v1166_v3, %v1167_v5  ;;  %v1099_v7 = vsel %vm666_vm1, %v1097_v2, %v1098_v4 }
 0x249   : > { %1926 = vmatmul.msk.f32.vlgmr.msrb.gmra.mxu3 %vm1102_vm11, %v1168_v6  ;;  %1914 = vmatmul.msk.f32.vlgmr.msra.gmra.mxu1 %vm1102_vm11, %v1099_v7 }
 0x24b   : > { %v1071_v9 = vpop.f32.mrf.mxu2 }
 0x24c   : > { %v1076_v10 = vmax.f32 %v1032_v8, %v1071_v9 }
 0x24e   : > { %v1100_v11 = vrot.slane %v1076_v10, 2  ;;  %v1169_v12 = vrot.slane %v1076_v10, 4 }
 0x250   : > { %v1170_v13 = vsel %vm754_vm0, %v1167_v5, %v1169_v12  ;;  %v1101_v14 = vsel %vm666_vm1, %v1098_v4, %v1100_v11 }
 0x251   : > { %1927 = vmatmul.msk.f32.gmra.mxu3 %vm1102_vm11, %v1170_v13  ;;  %1915 = vmatmul.msk.f32.gmra.mxu1 %vm1102_vm11, %v1101_v14 }
 0x2c1   : > { %v1151_v42 = vpop.f32.mrf.mxu2 }
 0x2c6   : > { %v1124_v39 = vpop.f32.mrf.mxu1 }
 0x2c7   : > { %v1152_v45 = vadd.f32 %v1151_v42, %v1124_v39  ;;  %v1401_v39 = vld [vmem:[%s2545_s13 + $0x28] sm:$0xff]  ;;  %v1398_v42 = vld [vmem:[%s2545_s13 + $0x10] sm:$0xff] }
 0x2c9   : > { %v1154_v56 = vpop.f32.mrf.mxu2 }
 0x2cc   : > { %v1192_v49 = vpop.f32.mrf.mxu3 }
 0x2cd   : > { %v1198_v50 = vadd.f32 %v1192_v49, %v1152_v45  ;;  %v1952_v45 = vld [vmem:[%s2545_s13 + $0xb0] sm:$0xff]  ;;  %v1950_v49 = vld [vmem:[%s2545_s13 + $0xa0] sm:$0xff] }
 0x2ce   : > { %v1127_v54 = vpop.f32.mrf.mxu1 }
 0x2cf   : > { %v1204_v53 = vadd.f32 %v2086_v46, %v1198_v50  ;;  %v1155_v57 = vadd.f32 %v1154_v56, %v1127_v54  ;;  %v1941_v50 = vld [vmem:[%s2545_s13 + $0x68] sm:$0xff]  ;;  %v1948_v54 = vld [vmem:[%s2545_s13 + $0x90] sm:$0xff] }
 0x2d0   : > { %v1947_v56 = vld [vmem:[%s2545_s13 + $0x88] sm:$0xff] }
 0x2d1   : > { %v1928_v55 = vmul.f32 -1.442695, %v1204_v53  ;;  %vm1206_vm3 = vcmp.lt.f32.partialorder %v1204_v53, 10.0 }
 0x2d3   : > { %2105 = vpow2.f32 %v1928_v55  ;;  %v1938_v55 = vld [vmem:[%s2545_s13 + $0x50] sm:$0xff] }
 0x2d4   : > { %v1195_v58 = vpop.f32.mrf.mxu3 }
 0x2d5   : > { %v1199_v59 = vadd.f32 %v1195_v58, %v1155_v57  ;;  %v1946_v57 = vld [vmem:[%s2545_s13 + $0x80] sm:$0xff]  ;;  %v1937_v58 = vld [vmem:[%s2545_s13 + $0x48] sm:$0xff] }
 0x2d7   : > { %v1205_v60 = vadd.f32 %v2086_v46, %v1199_v59  ;;  %v1942_v46 = vld [vmem:[%s2545_s13 + $0x70] sm:$0xff]  ;;  %v1936_v59 = vld [vmem:[%s2545_s13 + $0x40] sm:$0xff] }
 0x2d8   : > { %1429 = vmatpush.msrb.mxu0 %v1942_v46  ;;  %v1529_v46 = vld [vmem:[%s2551_s14 + $0x28] sm:$0xff] }
 0x2d9   : > { %v2106_v61 = vpop.eup %2105  ;;  %v1929_v62 = vmul.f32 -1.442695, %v1205_v60  ;;  %vm1207_vm8 = vcmp.lt.f32.partialorder %v1205_v60, 10.0 }
 0x2da   : > { %v1214_v63 = vadd.f32 1.0, %v2106_v61  ;;  %1430 = vmatpush.msrb.mxu0 %v1941_v50  ;;  %v1528_v50 = vld [vmem:[%s2551_s14 + $0x20] sm:$0xff] }
 0x2db   : > { %2107 = vpow2.f32 %v1929_v62 }
 0x2dc   : > { %2109 = vrcp.f32 %v1214_v63  ;;  %v1227_v5 = vand.u32 2147483648, %v1214_v63  ;;  %v1225_v7 = vand.u32 2147483647, %v1214_v63  ;;  %vm1221_vm13 = vweird.f32 %v1214_v63  ;;  %1431 = vmatpush.msrb.mxu0 %v1940_v52  ;;  %v1993_v52 = vld [vmem:[%s2551_s14 + $0x1a8] sm:$0xff] }
 0x2de   : > { %v1228_v10 = vor.u32 1.1754944e-38, %v1227_v5  ;;  %vm1226_vm15 = vcmp.eq.f32.partialorder %v1225_v7, 8.507059e+37 }
 0x2e1   : > { %v2108_v0 = vpop.eup %2107 }
 0x2e2   : > { %v2110_v1 = vpop.eup %2109  ;;  %v1215_v2 = vadd.f32 1.0, %v2108_v0 }
 0x2e3   : > { %v1217_v3 = vmul.f32 %v2110_v1, %v1214_v63  ;;  %vm1222_vm12 = vweird.f32 %v2110_v1 }
 0x2e4   : > { %2111 = vrcp.f32 %v1215_v2  ;;  %vm1223_vm14 = vmor %vm1221_vm13, %vm1222_vm12  ;;  %v1242_v16 = vand.u32 2147483648, %v1215_v2  ;;  %v1240_v19 = vand.u32 2147483647, %v1215_v2  ;;  %vm1236_vm5 = vweird.f32 %v1215_v2 }
 0x2e5   : > { %v1218_v4 = vsub.f32 1.0, %v1217_v3 }
 0x2e6   : > { %v1243_v21 = vor.u32 1.1754944e-38, %v1242_v16  ;;  %vm1241_vm7 = vcmp.eq.f32.partialorder %v1240_v19, 8.507059e+37  ;;  %v2002_v16 = vld [vmem:[%s2551_s14 + $0x1f0] sm:$0xff]  ;;  %v1985_v19 = vld [vmem:[%s2551_s14 + $0x168] sm:$0xff] }
 0x2e7   : > { %v1219_v6 = vmul.f32 %v2110_v1, %v1218_v4 }
 0x2e9   : > { %v1220_v8 = vadd.f32 %v2110_v1, %v1219_v6 }
 0x2ea   : > { %v2112_v9 = vpop.eup %2111 }
 0x2eb   : > { %v1224_v11 = vsel %vm1223_vm14, %v2110_v1, %v1220_v8  ;;  %v1232_v12 = vmul.f32 %v2112_v9, %v1215_v2  ;;  %vm1237_vm4 = vweird.f32 %v2112_v9  ;;  %v1539_v8 = vld [vmem:[%s2551_s14 + $0x78] sm:$0xff] }
 0x2ec   : > { %v1229_v13 = vsel %vm1226_vm15, %v1228_v10, %v1224_v11  ;;  %vm1238_vm6 = vmor %vm1236_vm5, %vm1237_vm4  ;;  %1580 = vmatpush.msra.mxu1 %v1539_v8  ;;  %v1538_v10 = vld [vmem:[%s2551_s14 + $0x70] sm:$0xff]  ;;  %v1987_v11 = vld [vmem:[%s2551_s14 + $0x178] sm:$0xff] }
 0x2ed   : > { %v1246_v14 = vmul.f32 %v1229_v13, %v1204_v53  ;;  %v1233_v15 = vsub.f32 1.0, %v1232_v12  ;;  %v1939_v53 = vld [vmem:[%s2545_s13 + $0x58] sm:$0xff]  ;;  %v1970_v13 = vld [vmem:[%s2551_s14 + $0xf0] sm:$0xff]  ;;  %v1524_v8 = vld [vmem:[%s2551_s14] sm:$0xff] }
 0x2ee   : > { %1432 = vmatpush.msrb.mxu0 %v1939_v53  ;;  %1581 = vmatpush.msra.mxu1 %v1538_v10  ;;  %v2003_v12 = vld [vmem:[%s2551_s14 + $0x1f8] sm:$0xff]  ;;  %v1960_v53 = vld [vmem:[%s2551_s14 + $0xa0] sm:$0xff]  ;;  %v1989_v10 = vld [vmem:[%s2551_s14 + $0x188] sm:$0xff] }
 0x2ef   : > { %v1248_v17 = vsel %vm1206_vm3, %v1246_v14, 10.0  ;;  %v1234_v18 = vmul.f32 %v2112_v9, %v1233_v15  ;;  %v1537_v14 = vld [vmem:[%s2551_s14 + $0x68] sm:$0xff]  ;;  %v1986_v15 = vld [vmem:[%s2551_s14 + $0x170] sm:$0xff] }
 0x2f0   : > { %1282 = vmatmul.f32.vlgmr.msra.gmra.mxu0 %v1248_v17  ;;  %1322 = vmatmul.f32.vlgmr.msrb.gmra.mxu1 %v1248_v17  ;;  %v1969_v17 = vld [vmem:[%s2551_s14 + $0xe8] sm:$0xff] }
 0x2f1   : > { %v1235_v20 = vadd.f32 %v2112_v9, %v1234_v18  ;;  %1433 = vmatpush.msrb.mxu0 %v1938_v55  ;;  %1582 = vmatpush.msra.mxu1 %v1537_v14  ;;  %v1536_v18 = vld [vmem:[%s2551_s14 + $0x60] sm:$0xff] }
 0x2f2   : > { %v1988_v14 = vld [vmem:[%s2551_s14 + $0x180] sm:$0xff] }
 0x2f3   : > { %v1239_v22 = vsel %vm1238_vm6, %v2112_v9, %v1235_v20  ;;  %1434 = vmatpush.msrb.mxu0 %v1937_v58  ;;  %v1971_v9 = vld [vmem:[%s2551_s14 + $0xf8] sm:$0xff]  ;;  %1583 = vmatpush.msra.mxu1 %v1536_v18  ;;  %v2001_v20 = vld [vmem:[%s2551_s14 + $0x1e8] sm:$0xff] }
 0x2f4   : > { %v1244_v23 = vsel %vm1241_vm7, %v1243_v21, %v1239_v22  ;;  %v1968_v21 = vld [vmem:[%s2551_s14 + $0xe0] sm:$0xff]  ;;  %v1535_v22 = vld [vmem:[%s2551_s14 + $0x58] sm:$0xff] }
 0x2f5   : > { %v1247_v24 = vmul.f32 %v1244_v23, %v1205_v60  ;;  %1435 = vmatpush.msrb.mxu0 %v1936_v59  ;;  %v1984_v23 = vld [vmem:[%s2551_s14 + $0x160] sm:$0xff]  ;;  %1584 = vmatpush.msra.mxu1 %v1535_v22  ;;  %v1959_v58 = vld [vmem:[%s2551_s14 + $0x98] sm:$0xff]  ;;  %v1526_v59 = vld [vmem:[%s2551_s14 + $0x10] sm:$0xff] }
 0x2f7   : > { %v1249_v25 = vsel %vm1207_vm8, %v1247_v24, 10.0  ;;  %1560 = vmatpush.msra.mxu0 %v1971_v9  ;;  %v2000_v24 = vld [vmem:[%s2551_s14 + $0x1e0] sm:$0xff]  ;;  %v1973_v9 = vld [vmem:[%s2551_s14 + $0x108] sm:$0xff] }
 0x2f8   : > { %1285 = vmatmul.f32.gmra.mxu0 %v1249_v25  ;;  %1325 = vmatmul.f32.gmra.mxu1 %v1249_v25  ;;  %v1967_v25 = vld [vmem:[%s2551_s14 + $0xd8] sm:$0xff] }
 0x2f9   : > { %1561 = vmatpush.msra.mxu0 %v1970_v13  ;;  %v1972_v13 = vld [vmem:[%s2551_s14 + $0x100] sm:$0xff] }
 0x2fb   : > { %1562 = vmatpush.msra.mxu0 %v1969_v17 }
 0x2fd   : > { %1563 = vmatpush.msra.mxu0 %v1968_v21 }
 0x2ff   : > { %1564 = vmatpush.msra.mxu0 %v1967_v25 }
 0x36d   : > { %v1283_v26 = vpop.f32.mrf.mxu0  ;;  %v1323_v27 = vpop.f32.mrf.mxu1 }
 0x36e   : > { %v1329_v31 = vmax.f32 %v1283_v26, %v1323_v27  ;;  %v1534_v26 = vld [vmem:[%s2551_s14 + $0x50] sm:$0xff]  ;;  %v1983_v27 = vld [vmem:[%s2551_s14 + $0x158] sm:$0xff] }
 0x36f   : > { %1585 = vmatpush.msra.mxu1 %v1534_v26 }
 0x375   : > { %v1286_v28 = vpop.f32.mrf.mxu0  ;;  %v1326_v29 = vpop.f32.mrf.mxu1 }
 0x376   : > { %v1330_v30 = vmax.f32 %v1286_v28, %v1326_v29  ;;  %v1999_v28 = vld [vmem:[%s2551_s14 + $0x1d8] sm:$0xff]  ;;  %v1966_v29 = vld [vmem:[%s2551_s14 + $0xd0] sm:$0xff] }
 0x377   : > { %1565 = vmatpush.msra.mxu0 %v1966_v29 }
 0x378   : > { %1353 = vmatpush.msrb.mxu2 %v1330_v30  ;;  %1385 = vmatpush.msra.mxu3 %v1330_v30  ;;  %v1533_v30 = vld [vmem:[%s2551_s14 + $0x48] sm:$0xff] }
 0x379   : > { %1586 = vmatpush.msra.mxu1 %v1533_v30 }
 0x37a   : > { %1354 = vmatpush.msrb.mxu2 %v1329_v31  ;;  %1386 = vmatpush.msra.mxu3 %v1329_v31  ;;  %v1982_v31 = vld [vmem:[%s2551_s14 + $0x150] sm:$0xff] }
 0x37b   : > { %1930 = vmatmul.msk.f32.vlgmr.msrb.gmra.mxu2 %vm676_vm2, %v1331_v32  ;;  %1934 = vmatmul.msk.f32.vlgmr.msra.gmra.mxu3 %vm676_vm2, %v1932_v33  ;;  %v1998_v32 = vld [vmem:[%s2551_s14 + $0x1d0] sm:$0xff]  ;;  %v1965_v33 = vld [vmem:[%s2551_s14 + $0xc8] sm:$0xff] }
 0x37c   : > { %1450 = vmatpush.msra.mxu2 %v1403_v34  ;;  %1484 = vmatpush.msrb.mxu3 %v1953_v35  ;;  %v1532_v34 = vld [vmem:[%s2551_s14 + $0x40] sm:$0xff]  ;;  %v1981_v35 = vld [vmem:[%s2551_s14 + $0x148] sm:$0xff] }
 0x37d   : > { %1566 = vmatpush.msra.mxu0 %v1965_v33  ;;  %1587 = vmatpush.msra.mxu1 %v1532_v34 }
 0x37e   : > { %1451 = vmatpush.msra.mxu2 %v1402_v36  ;;  %1485 = vmatpush.msrb.mxu3 %v1952_v45  ;;  %v1997_v36 = vld [vmem:[%s2551_s14 + $0x1c8] sm:$0xff]  ;;  %v1962_v45 = vld [vmem:[%s2551_s14 + $0xb0] sm:$0xff] }
 0x380   : > { %1452 = vmatpush.msra.mxu2 %v1401_v39  ;;  %1486 = vmatpush.msrb.mxu3 %v1951_v48  ;;  %v1980_v39 = vld [vmem:[%s2551_s14 + $0x140] sm:$0xff]  ;;  %v1994_v48 = vld [vmem:[%s2551_s14 + $0x1b0] sm:$0xff] }
 0x382   : > { %1453 = vmatpush.msra.mxu2 %v1400_v40  ;;  %1487 = vmatpush.msrb.mxu3 %v1950_v49  ;;  %v1996_v40 = vld [vmem:[%s2551_s14 + $0x1c0] sm:$0xff]  ;;  %v1961_v49 = vld [vmem:[%s2551_s14 + $0xa8] sm:$0xff] }
 0x383   : > { %1931 = vmatmul.msk.f32.gmra.mxu2 %vm676_vm2, %v1332_v37  ;;  %1935 = vmatmul.msk.f32.gmra.mxu3 %vm676_vm2, %v1933_v38  ;;  %v1964_v37 = vld [vmem:[%s2551_s14 + $0xc0] sm:$0xff]  ;;  %v1531_v38 = vld [vmem:[%s2551_s14 + $0x38] sm:$0xff] }
 0x384   : > { %1454 = vmatpush.msra.mxu2 %v1399_v41  ;;  %1488 = vmatpush.msrb.mxu3 %v1949_v51  ;;  %v1963_v41 = vld [vmem:[%s2551_s14 + $0xb8] sm:$0xff]  ;;  %v1977_v51 = vld [vmem:[%s2551_s14 + $0x128] sm:$0xff] }
 0x385   : > { %1567 = vmatpush.msra.mxu0 %v1964_v37  ;;  %1588 = vmatpush.msra.mxu1 %v1531_v38  ;;  %v2088_v38 = vld [vmem:[%s646_s22] ss:$0 sm:$0xff] }
 0x386   : > { %1455 = vmatpush.msra.mxu2 %v1398_v42  ;;  %1489 = vmatpush.msrb.mxu3 %v1948_v54  ;;  %v1530_v42 = vld [vmem:[%s2551_s14 + $0x30] sm:$0xff]  ;;  %v1527_v54 = vld [vmem:[%s2551_s14 + $0x18] sm:$0xff] }
 0x387   : > { %1568 = vmatpush.msra.mxu0 %v1963_v41  ;;  %1589 = vmatpush.msra.mxu1 %v1530_v42 }
 0x388   : > { %1456 = vmatpush.msra.mxu2 %v1397_v44  ;;  %1490 = vmatpush.msrb.mxu3 %v1947_v56  ;;  %v1995_v44 = vld [vmem:[%s2551_s14 + $0x1b8] sm:$0xff]  ;;  %v1976_v56 = vld [vmem:[%s2551_s14 + $0x120] sm:$0xff] }
 0x389   : > { %1569 = vmatpush.msra.mxu0 %v1962_v45  ;;  %1590 = vmatpush.msra.mxu1 %v1529_v46 }
 0x38a   : > { %1457 = vmatpush.msra.mxu2 %v1396_v47  ;;  %1491 = vmatpush.msrb.mxu3 %v1946_v57  ;;  %v1978_v47 = vld [vmem:[%s2551_s14 + $0x130] sm:$0xff]  ;;  %v1992_v57 = vld [vmem:[%s2551_s14 + $0x1a0] sm:$0xff] }
 0x38b   : > { %1570 = vmatpush.msra.mxu0 %v1961_v49  ;;  %1591 = vmatpush.msra.mxu1 %v1528_v50 }
 0x38c   : > { %1619 = vmatpush.msrb.mxu2 %v1987_v11  ;;  %1659 = vmatpush.msra.mxu3 %v2003_v12  ;;  %v1956_v12 = vld [vmem:[%s2551_s14 + $0x80] sm:$0xff] }
 0x38d   : > { %1571 = vmatpush.msra.mxu0 %v1960_v53  ;;  %1592 = vmatpush.msra.mxu1 %v1527_v54 }
 0x38e   : > { %1620 = vmatpush.msrb.mxu2 %v1986_v15  ;;  %1660 = vmatpush.msra.mxu3 %v2002_v16 }
 0x38f   : > { %1572 = vmatpush.msra.mxu0 %v1959_v58  ;;  %1593 = vmatpush.msra.mxu1 %v1526_v59 }
 0x390   : > { %1621 = vmatpush.msrb.mxu2 %v1985_v19  ;;  %1661 = vmatpush.msra.mxu3 %v2001_v20 }
 0x392   : > { %1622 = vmatpush.msrb.mxu2 %v1984_v23  ;;  %1662 = vmatpush.msra.mxu3 %v2000_v24 }
 0x394   : > { %1623 = vmatpush.msrb.mxu2 %v1983_v27  ;;  %1663 = vmatpush.msra.mxu3 %v1999_v28 }
 0x396   : > { %1624 = vmatpush.msrb.mxu2 %v1982_v31  ;;  %1664 = vmatpush.msra.mxu3 %v1998_v32 }
 0x398   : > { %1625 = vmatpush.msrb.mxu2 %v1981_v35  ;;  %1665 = vmatpush.msra.mxu3 %v1997_v36 }
 0x39a   : > { %1626 = vmatpush.msrb.mxu2 %v1980_v39  ;;  %1666 = vmatpush.msra.mxu3 %v1996_v40 }
 0x39c   : > { %1627 = vmatpush.msrb.mxu2 %v1979_v43  ;;  %1667 = vmatpush.msra.mxu3 %v1995_v44 }
 0x39e   : > { %1628 = vmatpush.msrb.mxu2 %v1978_v47  ;;  %1668 = vmatpush.msra.mxu3 %v1994_v48 }
 0x3a0   : > { %1629 = vmatpush.msrb.mxu2 %v1977_v51  ;;  %1669 = vmatpush.msra.mxu3 %v1993_v52 }
 0x3a2   : > { %1630 = vmatpush.msrb.mxu2 %v1976_v56  ;;  %1670 = vmatpush.msra.mxu3 %v1992_v57 }
 0x3fe   : > { %v1356_v60 = vpop.f32.mrf.mxu2  ;;  %v1388_v61 = vpop.f32.mrf.mxu3 }
 0x3ff   : > { %v1394_v62 = vmax.f32 %v1356_v60, %v1388_v61  ;;  %v1975_v61 = vld [vmem:[%s2551_s14 + $0x118] sm:$0xff] }
 0x400   : > { %1631 = vmatpush.msrb.mxu2 %v1975_v61 }
 0x401   : > { %1945 = vmatmul.msk.f32.vlgmr.msra.gmra.mxu2 %vm1102_vm11, %v1394_v62  ;;  %v1415_v2 = vrot.slane %v1394_v62, 2  ;;  %v1471_v3 = vrot.slane %v1394_v62, 4  ;;  %v1991_v62 = vld [vmem:[%s2551_s14 + $0x198] sm:$0xff] }
 0x402   : > { %1671 = vmatpush.msra.mxu3 %v1991_v62 }
 0x406   : > { %v1359_v63 = vpop.f32.mrf.mxu2  ;;  %v1391_v0 = vpop.f32.mrf.mxu3 }
 0x407   : > { %v1395_v1 = vmax.f32 %v1359_v63, %v1391_v0  ;;  %v2087_v0 = vld [vmem:[%s643_s23] ss:$0 sm:$0xff] }
 0x409   : > { %v1416_v4 = vrot.slane %v1395_v1, 2  ;;  %v1472_v5 = vrot.slane %v1395_v1, 4  ;;  %v1958_v1 = vld [vmem:[%s2551_s14 + $0x90] sm:$0xff] }
 0x40a   : > { %1573 = vmatpush.msra.mxu0 %v1958_v1 }
 0x40b   : > { %v1473_v6 = vsel %vm754_vm0, %v1471_v3, %v1472_v5  ;;  %v1417_v7 = vsel %vm666_vm1, %v1415_v2, %v1416_v4  ;;  %v1525_v2 = vld [vmem:[%s2551_s14 + $0x8] sm:$0xff]  ;;  %v1974_v4 = vld [vmem:[%s2551_s14 + $0x110] sm:$0xff] }
 0x40c   : > { %1954 = vmatmul.msk.f32.vlgmr.msrb.gmra.mxu3 %vm1102_vm11, %v1473_v6  ;;  %1944 = vmatmul.msk.f32.vlgmr.msrb.gmra.mxu0 %vm1102_vm11, %v1417_v7  ;;  %v1990_v5 = vld [vmem:[%s2551_s14 + $0x190] sm:$0xff]  ;;  %v1957_v7 = vld [vmem:[%s2551_s14 + $0x88] sm:$0xff] }
 0x40d   : > { %1594 = vmatpush.msra.mxu1 %v1525_v2  ;;  %1632 = vmatpush.msrb.mxu2 %v1974_v4 }
 0x40e   : > { %1672 = vmatpush.msra.mxu3 %v1990_v5  ;;  %1574 = vmatpush.msra.mxu0 %v1957_v7 }
 0x40f   : > { %1595 = vmatpush.msra.mxu1 %v1524_v8  ;;  %1633 = vmatpush.msrb.mxu2 %v1973_v9 }
 0x410   : > { %1673 = vmatpush.msra.mxu3 %v1989_v10  ;;  %1575 = vmatpush.msra.mxu0 %v1956_v12 }
 0x411   : > { %1634 = vmatpush.msrb.mxu2 %v1972_v13 }
 0x412   : > { %1674 = vmatpush.msra.mxu3 %v1988_v14 }
 0x484   : > { %v1459_v60 = vpop.f32.mrf.mxu2 }
 0x489   : > { %v1437_v55 = vpop.f32.mrf.mxu0 }
 0x48a   : > { %v1460_v63 = vadd.f32 %v1459_v60, %v1437_v55 }
 0x48f   : > { %v1493_v3 = vpop.f32.mrf.mxu3 }
 0x490   : > { %v1496_v6 = vadd.f32 %v1493_v3, %v1460_v63 }
 0x492   : > { %v1501_v11 = vadd.f32 %v2087_v0, %v1496_v6 }
 0x494   : > { %v1955_v15 = vmul.f32 -1.442695, %v1501_v11  ;;  %vm1502_vm10 = vcmp.lt.f32.partialorder %v1501_v11, 10.0 }
 0x496   : > { %2113 = vpow2.f32 %v1955_v15 }
 0x49c   : > { %v2114_v16 = vpop.eup %2113 }
 0x49d   : > { %v1506_v17 = vadd.f32 1.0, %v2114_v16 }
 0x49f   : > { %2115 = vrcp.f32 %v1506_v17  ;;  %v1518_v21 = vand.u32 2147483648, %v1506_v17  ;;  %v1516_v23 = vand.u32 2147483647, %v1506_v17  ;;  %vm1512_vm1 = vweird.f32 %v1506_v17 }
 0x4a1   : > { %v1519_v25 = vor.u32 1.1754944e-38, %v1518_v21  ;;  %vm1517_vm9 = vcmp.eq.f32.partialorder %v1516_v23, 8.507059e+37 }
 0x4a5   : > { %v2116_v18 = vpop.eup %2115 }
 0x4a6   : > { %v1508_v19 = vmul.f32 %v2116_v18, %v1506_v17  ;;  %vm1513_vm0 = vweird.f32 %v2116_v18 }
 0x4a7   : > { %vm1514_vm2 = vmor %vm1512_vm1, %vm1513_vm0 }
 0x4a8   : > { %v1509_v20 = vsub.f32 1.0, %v1508_v19 }
 0x4aa   : > { %v1510_v22 = vmul.f32 %v2116_v18, %v1509_v20 }
 0x4ac   : > { %v1511_v24 = vadd.f32 %v2116_v18, %v1510_v22 }
 0x4ae   : > { %v1515_v26 = vsel %vm1514_vm2, %v2116_v18, %v1511_v24 }
 0x4af   : > { %v1520_v27 = vsel %vm1517_vm9, %v1519_v25, %v1515_v26 }
 0x4b0   : > { %v1522_v28 = vmul.f32 %v1520_v27, %v1501_v11 }
 0x4b2   : > { %v1523_v29 = vsel %vm1502_vm10, %v1522_v28, 10.0 }
 0x4b3   : > { %1596 = vmatmul.f32.vlgmr.msra.gmra.mxu1 %v1523_v29  ;;  %v1558_v30 = vrot.slane %v1523_v29, 2  ;;  %v1617_v31 = vrot.slane %v1523_v29, 4  ;;  %v1657_v32 = vrot.slane %v1523_v29, 6 }
 0x4b5   : > { %1576 = vmatmul.f32.vlgmr.msra.gmra.mxu0 %v1558_v30  ;;  %1635 = vmatmul.f32.vlgmr.msrb.gmra.mxu2 %v1617_v31 }
 0x4b6   : > { %1675 = vmatmul.f32.vlgmr.msra.gmra.mxu3 %v1657_v32 }
 0x530   : > { %v1597_v34 = vpop.f32.mrf.mxu1 }
 0x532   : > { %v1577_v33 = vpop.f32.mrf.mxu0 }
 0x533   : > { %v1598_v35 = vadd.f32 %v1597_v34, %v1577_v33 }
 0x538   : > { %v1636_v36 = vpop.f32.mrf.mxu2 }
 0x539   : > { %v1639_v37 = vadd.f32 %v1636_v36, %v1598_v35  ;;  %v1676_v39 = vpop.f32.mrf.mxu3 }
 0x53b   : > { %v1679_v40 = vadd.f32 %v1676_v39, %v1639_v37 }
 0x53d   : > { %v1684_v41 = vadd.f32 %v2088_v38, %v1679_v40 }
 0x53f   : > { %1685 = vst [vmem:[%s650_s25] sm:$0x3] %v1684_v41 }
 0x540 PF: > { %s2880_s28 = sld [smem:[#allocation14_spill]]  ;;  %s2883_s25 = smov %s2301_s26 }
 0x541   : > { %s2881_s9 = sld [smem:[#allocation13_spill]] }
 0x542   : > { %s2882_s27 = sld [smem:[#allocation15_spill]] }
 0x546   : > { %p27_p1 = scmp.ge.s32.totalorder %s2880_s28, 4  }
 0x547   : > { %s2884_s26 = smov %s2881_s9 }
 0x548   :  { %29 = sbr.rel (!%p27_p1) target bundleno = 14 (0xe), region = 172 }
 0x54d   :  { %1705 = vsyncpa [#allocation3], 1 }
 0x54e   :  { %1707 = vsyncpa [#allocation3 + $0x1], 1 }
 0x54f   :  { %1708 = vsyncpa [#allocation5], 1 }
 0x550   :  { %1710 = vsyncpa [#allocation5 + $0x1], 1 }
 0x551   :  { %1711 = vsyncpa [#allocation8], 1 }

</bundles_post_ra>
